<compile_context>
chip_gen: v5e
topology: v5e:2x2
jax: 0.10.0
libtpu: 0.0.40
codegen_flags: <defaults>
</compile_context>

<pallas_src>
import numpy as np
import jax
import jax.numpy as jnp
from jax.experimental import pallas as pl
from jax.experimental.pallas import tpu as pltpu

W1 = 512                      # hidden width (module-level constant `w1`)
INPUT_DIM = 64                # input_dim
BOTTLE_DIM = 16               # bottle_dim
NOISE_VAR = 0.0               # noise_var (default 0)
BN_EPS = 1e-5                 # nn.BatchNorm1d default eps

# ---- packed auxiliary-vector slab layout: one (16, 512) f32 array, one DMA ----
VEC_ROWS = 16
VEC_COLS = W1
R_B1, R_G1, R_BE1 = 0, 1, 2           # layer1: bias, gamma, beta       (512)
R_B2, R_G2, R_BE2 = 3, 4, 5           # layer2: bias, gamma, beta       (256)
R_B3, R_NOISE = 6, 7                  # bottleneck bias, noise          (16)
R_B4, R_G4, R_BE4 = 8, 9, 10          # layer4: bias, gamma, beta       (256)
R_B5, R_G5, R_BE5 = 11, 12, 13        # layer5: bias, gamma, beta       (512)
R_B6 = 14                             # output bias                     (64)
# row 15: padding


def autoencoder6_kernel(x_ref,
                        w1_ref, w2_ref, w3_ref, w4_ref, w5_ref, w6_ref,
                        vec_ref,
                        yhat_ref, l_ref):
    B = x_ref.shape[0]
    inv_b = 1.0 / B

    def vrow(r, width):
        # static slice of the packed slab -> (1, width) f32
        return vec_ref[r:r + 1, 0:width]

    def bn_relu(h, g_row, be_row, width):
        # one-pass training-mode BatchNorm1d (biased variance) folded into a
        # single scale/shift, followed by ReLU.
        gamma = vrow(g_row, width)
        beta = vrow(be_row, width)
        s = jnp.sum(h, axis=0, keepdims=True)
        ss = jnp.sum(h * h, axis=0, keepdims=True)
        mu = s * inv_b
        var = jnp.maximum(ss * inv_b - mu * mu, 0.0)      # clamp tiny negatives
        scale = gamma * jax.lax.rsqrt(var + BN_EPS)
        shift = beta - mu * scale
        return jnp.maximum(h * scale + shift, 0.0)

    x = x_ref[...].astype(jnp.bfloat16)                   # (B, 64)

    # ---------------- encoder ----------------
    h = jnp.dot(x, w1_ref[...], preferred_element_type=jnp.float32) + vrow(R_B1, W1)
    h = bn_relu(h, R_G1, R_BE1, W1)                       # (B, 512) f32

    h = jnp.dot(h.astype(jnp.bfloat16), w2_ref[...],
                preferred_element_type=jnp.float32) + vrow(R_B2, W1 // 2)
    h = bn_relu(h, R_G2, R_BE2, W1 // 2)                  # (B, 256) f32

    l = jnp.tanh(jnp.dot(h.astype(jnp.bfloat16), w3_ref[...],
                         preferred_element_type=jnp.float32) + vrow(R_B3, BOTTLE_DIM))
    l = l + vrow(R_NOISE, BOTTLE_DIM)                     # post-noise latent (as in torch)
    l_ref[...] = l

    # ---------------- decoder ----------------
    d = jnp.dot(l.astype(jnp.bfloat16), w4_ref[...],
                preferred_element_type=jnp.float32) + vrow(R_B4, W1 // 2)
    d = bn_relu(d, R_G4, R_BE4, W1 // 2)                  # (B, 256) f32

    d = jnp.dot(d.astype(jnp.bfloat16), w5_ref[...],
                preferred_element_type=jnp.float32) + vrow(R_B5, W1)
    d = bn_relu(d, R_G5, R_BE5, W1)                       # (B, 512) f32

    yhat_ref[...] = (jnp.dot(d.astype(jnp.bfloat16), w6_ref[...],
                             preferred_element_type=jnp.float32)
                     + vrow(R_B6, INPUT_DIM))             # (B, 64) f32


def make_params(key):
    """Deterministic synthetic parameters (shapes match the torch module).

    Weights are stored bf16 (halved DMA + native MXU rate); all (F,) vectors
    stay f32 and are later packed into one slab.
    """
    dims = [
        (INPUT_DIM, W1), (W1, W1 // 2), (W1 // 2, BOTTLE_DIM),     # encoder linears
        (BOTTLE_DIM, W1 // 2), (W1 // 2, W1), (W1, INPUT_DIM),     # decoder linears
    ]
    keys = jax.random.split(key, len(dims))
    weights, biases = [], []
    for k, (fi, fo) in zip(keys, dims):
        scale = 1.0 / np.sqrt(fi)
        w = jax.random.uniform(k, (fi, fo), jnp.float32, -scale, scale)
        weights.append(w.astype(jnp.bfloat16))
        biases.append(jnp.zeros((fo,), jnp.float32))

    bn_dims = [W1, W1 // 2, W1 // 2, W1]      # bn after layers 1, 2, 4, 5
    gammas = [jnp.ones((f,), jnp.float32) for f in bn_dims]
    betas = [jnp.zeros((f,), jnp.float32) for f in bn_dims]
    return weights, biases, gammas, betas


def pack_aux(biases, gammas, betas, noise):
    """Pack 6 biases + 4 gammas + 4 betas + noise into one (16, 512) f32 slab."""
    b1, b2, b3, b4, b5, b6 = biases
    g1, g2, g4, g5 = gammas
    be1, be2, be4, be5 = betas
    rows = [
        (R_B1, b1), (R_G1, g1), (R_BE1, be1),
        (R_B2, b2), (R_G2, g2), (R_BE2, be2),
        (R_B3, b3), (R_NOISE, noise.reshape(-1).astype(jnp.float32)),
        (R_B4, b4), (R_G4, g4), (R_BE4, be4),
        (R_B5, b5), (R_G5, g5), (R_BE5, be5),
        (R_B6, b6),
    ]
    slab = jnp.zeros((VEC_ROWS, VEC_COLS), jnp.float32)
    for r, v in rows:
        slab = slab.at[r, : v.shape[0]].set(v)
    return slab


@jax.jit
def neural_network6_forward(y, weights, vec_slab):
    B = y.shape[0]
    x = y.reshape(B, INPUT_DIM).astype(jnp.float32)       # y.reshape((B, input_dim))
    w1_, w2_, w3_, w4_, w5_, w6_ = weights

    n_weight_elems = sum(int(np.prod(w.shape)) for w in weights)   # 335_872
    flops = 2 * B * n_weight_elems
    transcendentals = B * BOTTLE_DIM + 2 * (W1 + W1 // 2)          # tanh + 4 BN rsqrt
    bytes_accessed = (2 * n_weight_elems                           # bf16 weights
                      + vec_slab.size * 4                          # packed slab
                      + B * INPUT_DIM * 4 * 2                      # x in, yhat out
                      + B * BOTTLE_DIM * 4)                        # l out

    vmem = pl.BlockSpec(memory_space=pltpu.MemorySpace.VMEM)
    y_hat, l = pl.pallas_call(
        autoencoder6_kernel,
        out_shape=(
            jax.ShapeDtypeStruct((B, INPUT_DIM), jnp.float32),
            jax.ShapeDtypeStruct((B, BOTTLE_DIM), jnp.float32),
        ),
        in_specs=[vmem] * 8,
        out_specs=(vmem, vmem),
        compiler_params=pltpu.CompilerParams(vmem_limit_bytes=32 * 1024 * 1024),
        cost_estimate=pl.CostEstimate(
            flops=flops,
            transcendentals=transcendentals,
            bytes_accessed=bytes_accessed,
        ),
    )(x, w1_, w2_, w3_, w4_, w5_, w6_, vec_slab)
    return y_hat.reshape(B, 1, INPUT_DIM), l


def reference_forward(y, weights, biases, gammas, betas, noise):
    """Pure-JAX f32 reference (same bf16-rounded weights, upcast)."""
    B = y.shape[0]
    x = y.reshape(B, INPUT_DIM).astype(jnp.float32)
    w = [wi.astype(jnp.float32) for wi in weights]

    def bn_relu(h, g, b):
        mu = jnp.mean(h, axis=0, keepdims=True)
        var = jnp.mean((h - mu) ** 2, axis=0, keepdims=True)
        hn = (h - mu) / jnp.sqrt(var + BN_EPS)
        return jnp.maximum(hn * g + b, 0.0)

    h = bn_relu(x @ w[0] + biases[0], gammas[0], betas[0])
    h = bn_relu(h @ w[1] + biases[1], gammas[1], betas[1])
    l = jnp.tanh(h @ w[2] + biases[2]) + noise
    d = bn_relu(l @ w[3] + biases[3], gammas[2], betas[2])
    d = bn_relu(d @ w[4] + biases[4], gammas[3], betas[3])
    y_hat = d @ w[5] + biases[5]
    return y_hat.reshape(B, 1, INPUT_DIM), l


if __name__ == "__main__":
    key = jax.random.PRNGKey(0)
    k_param, k_in, k_noise = jax.random.split(key, 3)

    weights, biases, gammas, betas = make_params(k_param)

    B = 8
    y = jax.random.normal(k_in, (B, 1, INPUT_DIM), jnp.float32)

    # noise term: sqrt(noise_var) * randn(1, bottle_dim)  (zero when noise_var == 0)
    noise = jnp.sqrt(NOISE_VAR) * jax.random.normal(k_noise, (1, BOTTLE_DIM), jnp.float32)
    vec_slab = pack_aux(biases, gammas, betas, noise)

    y_hat, l = neural_network6_forward(y, weights, vec_slab)
    jax.block_until_ready((y_hat, l))

    assert y_hat.shape == (B, 1, INPUT_DIM)
    assert l.shape == (B, BOTTLE_DIM)

    # loose tolerance: kernel casts activations to bf16 at MXU inputs
    y_ref, l_ref = reference_forward(y, weights, biases, gammas, betas, noise)
    assert float(jnp.max(jnp.abs(y_hat - y_ref))) < 0.25
    assert float(jnp.max(jnp.abs(l - l_ref))) < 0.25

    print("KERNEL_OK")
</pallas_src>

<mosaic_0001>
module attributes {stable_mosaic.version = 11 : i64} {
  func.func @autoencoder6_kernel(%arg0: memref<8x64xf32, #tpu.memory_space<vmem>>, %arg1: memref<64x512xbf16, #tpu.memory_space<vmem>>, %arg2: memref<512x256xbf16, #tpu.memory_space<vmem>>, %arg3: memref<256x16xbf16, #tpu.memory_space<vmem>>, %arg4: memref<16x256xbf16, #tpu.memory_space<vmem>>, %arg5: memref<256x512xbf16, #tpu.memory_space<vmem>>, %arg6: memref<512x64xbf16, #tpu.memory_space<vmem>>, %arg7: memref<16x512xf32, #tpu.memory_space<vmem>>, %arg8: memref<8x64xf32, #tpu.memory_space<vmem>>, %arg9: memref<8x16xf32, #tpu.memory_space<vmem>>) attributes {dimension_semantics = [], scalar_prefetch = 0 : i64, scratch_operands = 0 : i64, tpu.core_type = #tpu.core_type<tc>} {
    %c0 = arith.constant 0 : index
    %c0_0 = arith.constant 0 : index
    %0 = vector.load %arg0[%c0, %c0_0] : memref<8x64xf32, #tpu.memory_space<vmem>>, vector<8x64xf32>
    %1 = arith.truncf %0 : vector<8x64xf32> to vector<8x64xbf16>
    %c0_1 = arith.constant 0 : index
    %c0_2 = arith.constant 0 : index
    %2 = vector.load %arg1[%c0_1, %c0_2] : memref<64x512xbf16, #tpu.memory_space<vmem>>, vector<64x512xbf16>
    %cst = arith.constant dense<0.000000e+00> : vector<8x512xf32>
    %3 = tpu.matmul %1, %2, %cst {dimension_numbers = #tpu.dot_dimension_numbers<[1], [0], [0], [1], [0, 0, 1, 1], [], []>} : vector<8x64xbf16>, vector<64x512xbf16>, vector<8x512xf32> -> vector<8x512xf32>
    %c0_3 = arith.constant 0 : index
    %c0_4 = arith.constant 0 : index
    %4 = vector.load %arg7[%c0_3, %c0_4] : memref<16x512xf32, #tpu.memory_space<vmem>>, vector<1x512xf32>
    %5 = vector.broadcast %4 : vector<1x512xf32> to vector<8x512xf32>
    %6 = arith.addf %3, %5 : vector<8x512xf32>
    %c1 = arith.constant 1 : index
    %c0_5 = arith.constant 0 : index
    %7 = vector.load %arg7[%c1, %c0_5] : memref<16x512xf32, #tpu.memory_space<vmem>>, vector<1x512xf32>
    %c2 = arith.constant 2 : index
    %c0_6 = arith.constant 0 : index
    %8 = vector.load %arg7[%c2, %c0_6] : memref<16x512xf32, #tpu.memory_space<vmem>>, vector<1x512xf32>
    %cst_7 = arith.constant dense<0.000000e+00> : vector<512xf32>
    %9 = vector.multi_reduction <add>, %6, %cst_7 [0] : vector<8x512xf32> to vector<512xf32>
    %10 = vector.shape_cast %9 : vector<512xf32> to vector<1x512xf32>
    %11 = arith.mulf %6, %6 : vector<8x512xf32>
    %cst_8 = arith.constant dense<0.000000e+00> : vector<512xf32>
    %12 = vector.multi_reduction <add>, %11, %cst_8 [0] : vector<8x512xf32> to vector<512xf32>
    %13 = vector.shape_cast %12 : vector<512xf32> to vector<1x512xf32>
    %cst_9 = arith.constant 1.250000e-01 : f32
    %14 = vector.broadcast %cst_9 : f32 to vector<1x512xf32>
    %15 = arith.mulf %10, %14 : vector<1x512xf32>
    %cst_10 = arith.constant 1.250000e-01 : f32
    %16 = vector.broadcast %cst_10 : f32 to vector<1x512xf32>
    %17 = arith.mulf %13, %16 : vector<1x512xf32>
    %18 = arith.mulf %15, %15 : vector<1x512xf32>
    %19 = arith.subf %17, %18 : vector<1x512xf32>
    %cst_11 = arith.constant 0.000000e+00 : f32
    %20 = vector.broadcast %cst_11 : f32 to vector<1x512xf32>
    %21 = arith.maximumf %19, %20 : vector<1x512xf32>
    %cst_12 = arith.constant 9.99999974E-6 : f32
    %22 = vector.broadcast %cst_12 : f32 to vector<1x512xf32>
    %23 = arith.addf %21, %22 : vector<1x512xf32>
    %24 = math.rsqrt %23 : vector<1x512xf32>
    %25 = arith.mulf %7, %24 : vector<1x512xf32>
    %26 = arith.mulf %15, %25 : vector<1x512xf32>
    %27 = arith.subf %8, %26 : vector<1x512xf32>
    %28 = vector.broadcast %25 : vector<1x512xf32> to vector<8x512xf32>
    %29 = arith.mulf %6, %28 : vector<8x512xf32>
    %30 = vector.broadcast %27 : vector<1x512xf32> to vector<8x512xf32>
    %31 = arith.addf %29, %30 : vector<8x512xf32>
    %cst_13 = arith.constant 0.000000e+00 : f32
    %32 = vector.broadcast %cst_13 : f32 to vector<8x512xf32>
    %33 = arith.maximumf %31, %32 : vector<8x512xf32>
    %34 = arith.truncf %33 : vector<8x512xf32> to vector<8x512xbf16>
    %c0_14 = arith.constant 0 : index
    %c0_15 = arith.constant 0 : index
    %35 = vector.load %arg2[%c0_14, %c0_15] : memref<512x256xbf16, #tpu.memory_space<vmem>>, vector<512x256xbf16>
    %cst_16 = arith.constant dense<0.000000e+00> : vector<8x256xf32>
    %36 = tpu.matmul %34, %35, %cst_16 {dimension_numbers = #tpu.dot_dimension_numbers<[1], [0], [0], [1], [0, 0, 1, 1], [], []>} : vector<8x512xbf16>, vector<512x256xbf16>, vector<8x256xf32> -> vector<8x256xf32>
    %c3 = arith.constant 3 : index
    %c0_17 = arith.constant 0 : index
    %37 = vector.load %arg7[%c3, %c0_17] : memref<16x512xf32, #tpu.memory_space<vmem>>, vector<1x256xf32>
    %38 = vector.broadcast %37 : vector<1x256xf32> to vector<8x256xf32>
    %39 = arith.addf %36, %38 : vector<8x256xf32>
    %c4 = arith.constant 4 : index
    %c0_18 = arith.constant 0 : index
    %40 = vector.load %arg7[%c4, %c0_18] : memref<16x512xf32, #tpu.memory_space<vmem>>, vector<1x256xf32>
    %c5 = arith.constant 5 : index
    %c0_19 = arith.constant 0 : index
    %41 = vector.load %arg7[%c5, %c0_19] : memref<16x512xf32, #tpu.memory_space<vmem>>, vector<1x256xf32>
    %cst_20 = arith.constant dense<0.000000e+00> : vector<256xf32>
    %42 = vector.multi_reduction <add>, %39, %cst_20 [0] : vector<8x256xf32> to vector<256xf32>
    %43 = vector.shape_cast %42 : vector<256xf32> to vector<1x256xf32>
    %44 = arith.mulf %39, %39 : vector<8x256xf32>
    %cst_21 = arith.constant dense<0.000000e+00> : vector<256xf32>
    %45 = vector.multi_reduction <add>, %44, %cst_21 [0] : vector<8x256xf32> to vector<256xf32>
    %46 = vector.shape_cast %45 : vector<256xf32> to vector<1x256xf32>
    %cst_22 = arith.constant 1.250000e-01 : f32
    %47 = vector.broadcast %cst_22 : f32 to vector<1x256xf32>
    %48 = arith.mulf %43, %47 : vector<1x256xf32>
    %cst_23 = arith.constant 1.250000e-01 : f32
    %49 = vector.broadcast %cst_23 : f32 to vector<1x256xf32>
    %50 = arith.mulf %46, %49 : vector<1x256xf32>
    %51 = arith.mulf %48, %48 : vector<1x256xf32>
    %52 = arith.subf %50, %51 : vector<1x256xf32>
    %cst_24 = arith.constant 0.000000e+00 : f32
    %53 = vector.broadcast %cst_24 : f32 to vector<1x256xf32>
    %54 = arith.maximumf %52, %53 : vector<1x256xf32>
    %cst_25 = arith.constant 9.99999974E-6 : f32
    %55 = vector.broadcast %cst_25 : f32 to vector<1x256xf32>
    %56 = arith.addf %54, %55 : vector<1x256xf32>
    %57 = math.rsqrt %56 : vector<1x256xf32>
    %58 = arith.mulf %40, %57 : vector<1x256xf32>
    %59 = arith.mulf %48, %58 : vector<1x256xf32>
    %60 = arith.subf %41, %59 : vector<1x256xf32>
    %61 = vector.broadcast %58 : vector<1x256xf32> to vector<8x256xf32>
    %62 = arith.mulf %39, %61 : vector<8x256xf32>
    %63 = vector.broadcast %60 : vector<1x256xf32> to vector<8x256xf32>
    %64 = arith.addf %62, %63 : vector<8x256xf32>
    %cst_26 = arith.constant 0.000000e+00 : f32
    %65 = vector.broadcast %cst_26 : f32 to vector<8x256xf32>
    %66 = arith.maximumf %64, %65 : vector<8x256xf32>
    %67 = arith.truncf %66 : vector<8x256xf32> to vector<8x256xbf16>
    %c0_27 = arith.constant 0 : index
    %c0_28 = arith.constant 0 : index
    %68 = vector.load %arg3[%c0_27, %c0_28] : memref<256x16xbf16, #tpu.memory_space<vmem>>, vector<256x16xbf16>
    %cst_29 = arith.constant dense<0.000000e+00> : vector<8x16xf32>
    %69 = tpu.matmul %67, %68, %cst_29 {dimension_numbers = #tpu.dot_dimension_numbers<[1], [0], [0], [1], [0, 0, 1, 1], [], []>} : vector<8x256xbf16>, vector<256x16xbf16>, vector<8x16xf32> -> vector<8x16xf32>
    %c6 = arith.constant 6 : index
    %c0_30 = arith.constant 0 : index
    %70 = vector.load %arg7[%c6, %c0_30] : memref<16x512xf32, #tpu.memory_space<vmem>>, vector<1x16xf32>
    %71 = vector.broadcast %70 : vector<1x16xf32> to vector<8x16xf32>
    %72 = arith.addf %69, %71 : vector<8x16xf32>
    %73 = math.tanh %72 : vector<8x16xf32>
    %c7 = arith.constant 7 : index
    %c0_31 = arith.constant 0 : index
    %74 = vector.load %arg7[%c7, %c0_31] : memref<16x512xf32, #tpu.memory_space<vmem>>, vector<1x16xf32>
    %75 = vector.broadcast %74 : vector<1x16xf32> to vector<8x16xf32>
    %76 = arith.addf %73, %75 : vector<8x16xf32>
    %c0_32 = arith.constant 0 : index
    %c0_33 = arith.constant 0 : index
    %77 = vector.load %arg9[%c0_32, %c0_33] : memref<8x16xf32, #tpu.memory_space<vmem>>, vector<8x16xf32>
    tpu.vector_store %arg9[%c0_32, %c0_33], %76 {strides = array<i32>} : memref<8x16xf32, #tpu.memory_space<vmem>>, vector<8x16xf32>,
    %78 = arith.truncf %76 : vector<8x16xf32> to vector<8x16xbf16>
    %c0_34 = arith.constant 0 : index
    %c0_35 = arith.constant 0 : index
    %79 = vector.load %arg4[%c0_34, %c0_35] : memref<16x256xbf16, #tpu.memory_space<vmem>>, vector<16x256xbf16>
    %cst_36 = arith.constant dense<0.000000e+00> : vector<8x256xf32>
    %80 = tpu.matmul %78, %79, %cst_36 {dimension_numbers = #tpu.dot_dimension_numbers<[1], [0], [0], [1], [0, 0, 1, 1], [], []>} : vector<8x16xbf16>, vector<16x256xbf16>, vector<8x256xf32> -> vector<8x256xf32>
    %c8 = arith.constant 8 : index
    %c0_37 = arith.constant 0 : index
    %81 = vector.load %arg7[%c8, %c0_37] : memref<16x512xf32, #tpu.memory_space<vmem>>, vector<1x256xf32>
    %82 = vector.broadcast %81 : vector<1x256xf32> to vector<8x256xf32>
    %83 = arith.addf %80, %82 : vector<8x256xf32>
    %c9 = arith.constant 9 : index
    %c0_38 = arith.constant 0 : index
    %84 = vector.load %arg7[%c9, %c0_38] : memref<16x512xf32, #tpu.memory_space<vmem>>, vector<1x256xf32>
    %c10 = arith.constant 10 : index
    %c0_39 = arith.constant 0 : index
    %85 = vector.load %arg7[%c10, %c0_39] : memref<16x512xf32, #tpu.memory_space<vmem>>, vector<1x256xf32>
    %cst_40 = arith.constant dense<0.000000e+00> : vector<256xf32>
    %86 = vector.multi_reduction <add>, %83, %cst_40 [0] : vector<8x256xf32> to vector<256xf32>
    %87 = vector.shape_cast %86 : vector<256xf32> to vector<1x256xf32>
    %88 = arith.mulf %83, %83 : vector<8x256xf32>
    %cst_41 = arith.constant dense<0.000000e+00> : vector<256xf32>
    %89 = vector.multi_reduction <add>, %88, %cst_41 [0] : vector<8x256xf32> to vector<256xf32>
    %90 = vector.shape_cast %89 : vector<256xf32> to vector<1x256xf32>
    %cst_42 = arith.constant 1.250000e-01 : f32
    %91 = vector.broadcast %cst_42 : f32 to vector<1x256xf32>
    %92 = arith.mulf %87, %91 : vector<1x256xf32>
    %cst_43 = arith.constant 1.250000e-01 : f32
    %93 = vector.broadcast %cst_43 : f32 to vector<1x256xf32>
    %94 = arith.mulf %90, %93 : vector<1x256xf32>
    %95 = arith.mulf %92, %92 : vector<1x256xf32>
    %96 = arith.subf %94, %95 : vector<1x256xf32>
    %cst_44 = arith.constant 0.000000e+00 : f32
    %97 = vector.broadcast %cst_44 : f32 to vector<1x256xf32>
    %98 = arith.maximumf %96, %97 : vector<1x256xf32>
    %cst_45 = arith.constant 9.99999974E-6 : f32
    %99 = vector.broadcast %cst_45 : f32 to vector<1x256xf32>
    %100 = arith.addf %98, %99 : vector<1x256xf32>
    %101 = math.rsqrt %100 : vector<1x256xf32>
    %102 = arith.mulf %84, %101 : vector<1x256xf32>
    %103 = arith.mulf %92, %102 : vector<1x256xf32>
    %104 = arith.subf %85, %103 : vector<1x256xf32>
    %105 = vector.broadcast %102 : vector<1x256xf32> to vector<8x256xf32>
    %106 = arith.mulf %83, %105 : vector<8x256xf32>
    %107 = vector.broadcast %104 : vector<1x256xf32> to vector<8x256xf32>
    %108 = arith.addf %106, %107 : vector<8x256xf32>
    %cst_46 = arith.constant 0.000000e+00 : f32
    %109 = vector.broadcast %cst_46 : f32 to vector<8x256xf32>
    %110 = arith.maximumf %108, %109 : vector<8x256xf32>
    %111 = arith.truncf %110 : vector<8x256xf32> to vector<8x256xbf16>
    %c0_47 = arith.constant 0 : index
    %c0_48 = arith.constant 0 : index
    %112 = vector.load %arg5[%c0_47, %c0_48] : memref<256x512xbf16, #tpu.memory_space<vmem>>, vector<256x512xbf16>
    %cst_49 = arith.constant dense<0.000000e+00> : vector<8x512xf32>
    %113 = tpu.matmul %111, %112, %cst_49 {dimension_numbers = #tpu.dot_dimension_numbers<[1], [0], [0], [1], [0, 0, 1, 1], [], []>} : vector<8x256xbf16>, vector<256x512xbf16>, vector<8x512xf32> -> vector<8x512xf32>
    %c11 = arith.constant 11 : index
    %c0_50 = arith.constant 0 : index
    %114 = vector.load %arg7[%c11, %c0_50] : memref<16x512xf32, #tpu.memory_space<vmem>>, vector<1x512xf32>
    %115 = vector.broadcast %114 : vector<1x512xf32> to vector<8x512xf32>
    %116 = arith.addf %113, %115 : vector<8x512xf32>
    %c12 = arith.constant 12 : index
    %c0_51 = arith.constant 0 : index
    %117 = vector.load %arg7[%c12, %c0_51] : memref<16x512xf32, #tpu.memory_space<vmem>>, vector<1x512xf32>
    %c13 = arith.constant 13 : index
    %c0_52 = arith.constant 0 : index
    %118 = vector.load %arg7[%c13, %c0_52] : memref<16x512xf32, #tpu.memory_space<vmem>>, vector<1x512xf32>
    %cst_53 = arith.constant dense<0.000000e+00> : vector<512xf32>
    %119 = vector.multi_reduction <add>, %116, %cst_53 [0] : vector<8x512xf32> to vector<512xf32>
    %120 = vector.shape_cast %119 : vector<512xf32> to vector<1x512xf32>
    %121 = arith.mulf %116, %116 : vector<8x512xf32>
    %cst_54 = arith.constant dense<0.000000e+00> : vector<512xf32>
    %122 = vector.multi_reduction <add>, %121, %cst_54 [0] : vector<8x512xf32> to vector<512xf32>
    %123 = vector.shape_cast %122 : vector<512xf32> to vector<1x512xf32>
    %cst_55 = arith.constant 1.250000e-01 : f32
    %124 = vector.broadcast %cst_55 : f32 to vector<1x512xf32>
    %125 = arith.mulf %120, %124 : vector<1x512xf32>
    %cst_56 = arith.constant 1.250000e-01 : f32
    %126 = vector.broadcast %cst_56 : f32 to vector<1x512xf32>
    %127 = arith.mulf %123, %126 : vector<1x512xf32>
    %128 = arith.mulf %125, %125 : vector<1x512xf32>
    %129 = arith.subf %127, %128 : vector<1x512xf32>
    %cst_57 = arith.constant 0.000000e+00 : f32
    %130 = vector.broadcast %cst_57 : f32 to vector<1x512xf32>
    %131 = arith.maximumf %129, %130 : vector<1x512xf32>
    %cst_58 = arith.constant 9.99999974E-6 : f32
    %132 = vector.broadcast %cst_58 : f32 to vector<1x512xf32>
    %133 = arith.addf %131, %132 : vector<1x512xf32>
    %134 = math.rsqrt %133 : vector<1x512xf32>
    %135 = arith.mulf %117, %134 : vector<1x512xf32>
    %136 = arith.mulf %125, %135 : vector<1x512xf32>
    %137 = arith.subf %118, %136 : vector<1x512xf32>
    %138 = vector.broadcast %135 : vector<1x512xf32> to vector<8x512xf32>
    %139 = arith.mulf %116, %138 : vector<8x512xf32>
    %140 = vector.broadcast %137 : vector<1x512xf32> to vector<8x512xf32>
    %141 = arith.addf %139, %140 : vector<8x512xf32>
    %cst_59 = arith.constant 0.000000e+00 : f32
    %142 = vector.broadcast %cst_59 : f32 to vector<8x512xf32>
    %143 = arith.maximumf %141, %142 : vector<8x512xf32>
    %144 = arith.truncf %143 : vector<8x512xf32> to vector<8x512xbf16>
    %c0_60 = arith.constant 0 : index
    %c0_61 = arith.constant 0 : index
    %145 = vector.load %arg6[%c0_60, %c0_61] : memref<512x64xbf16, #tpu.memory_space<vmem>>, vector<512x64xbf16>
    %cst_62 = arith.constant dense<0.000000e+00> : vector<8x64xf32>
    %146 = tpu.matmul %144, %145, %cst_62 {dimension_numbers = #tpu.dot_dimension_numbers<[1], [0], [0], [1], [0, 0, 1, 1], [], []>} : vector<8x512xbf16>, vector<512x64xbf16>, vector<8x64xf32> -> vector<8x64xf32>
    %c14 = arith.constant 14 : index
    %c0_63 = arith.constant 0 : index
    %147 = vector.load %arg7[%c14, %c0_63] : memref<16x512xf32, #tpu.memory_space<vmem>>, vector<1x64xf32>
    %148 = vector.broadcast %147 : vector<1x64xf32> to vector<8x64xf32>
    %149 = arith.addf %146, %148 : vector<8x64xf32>
    %c0_64 = arith.constant 0 : index
    %c0_65 = arith.constant 0 : index
    %150 = vector.load %arg8[%c0_64, %c0_65] : memref<8x64xf32, #tpu.memory_space<vmem>>, vector<8x64xf32>
    tpu.vector_store %arg8[%c0_64, %c0_65], %149 {strides = array<i32>} : memref<8x64xf32, #tpu.memory_space<vmem>>, vector<8x64xf32>,
    return
  }
}

</mosaic_0001>

<bundles_post_ra>
// kernel: neural_network6_forward.1
= control target key start
LH: loop header
LB: loop body
LE: loop exit
PB: predicated region body
PF: predicated region fallthrough
CT: control target
= control target key end

     0   :  { %15 = vsyncpa [#allocation3], 0  ;;  %s4469_s0 = inlined_call_operand.hbm [shape: f32[8,64], index: 0, kind: input, shape index: {}]   ;;  %s4470_s1 = inlined_call_operand.hbm [shape: bf16[64,512], index: 1, kind: input, shape index: {}]   ;;  %s4471_s2 = inlined_call_operand.vmem [shape: bf16[512,256], index: 2, kind: input, shape index: {}]   ;;  %s4472_s3 = inlined_call_operand.vmem [shape: bf16[256,16], index: 3, kind: input, shape index: {}]   ;;  %s4473_s4 = inlined_call_operand.vmem [shape: bf16[16,256], index: 4, kind: input, shape index: {}]   ;;  %s4474_s5 = inlined_call_operand.hbm [shape: bf16[256,512], index: 5, kind: input, shape index: {}]   ;;  %s4475_s6 = inlined_call_operand.vmem [shape: bf16[512,64], index: 6, kind: input, shape index: {}]   ;;  %s4476_s7 = inlined_call_operand.hbm [shape: f32[16,512], index: 7, kind: input, shape index: {}]   ;;  %s4477_s8 = inlined_call_operand.hbm [shape: f32[8,64], index: 8, kind: output, shape index: {0}]   ;;  %s4478_s9 = inlined_call_operand.hbm [shape: f32[8,16], index: 9, kind: output, shape index: {1}]  }
   0x1   :  { %16 = vsyncpa [#allocation6], 0 }
   0x2   :  { %17 = vsyncpa [#allocation9], 0 }
   0x3   :  { %18 = vsyncpa [#allocation4], 0  ;;  %s35_s11 = sshll.u32 %s4470_s1, 4  ;;  %s36_s11 = int_to_ptr.hbm [resolvable:$true] %s35_s11 }
   0x4   :  { %19 = vsyncpa [#allocation12], 0  ;;  %s3528_s12 = smov [#allocation5]   ;;  %s25_s16 = sshll.u32 %s4469_s0, 4  ;;  %s26_s16 = int_to_ptr.hbm [resolvable:$true] %s25_s16 }
   0x5   :  { %s37_s13 = sshll.u32 %s3528_s12, 4  ;;  %s3529_s17 = smov 256   ;;  %s38_s13 = int_to_ptr.vmem [resolvable:$true] %s37_s13 }
   0x6   :  { %s3530_s18 = smov 16   ;;  %s3531_s19 = smov [#allocation2]  }
   0x7   :  { %43 = dma.hbm_to_vmem [thread:$0]  %s36_s11, 2048, %s38_s13, [#allocation6], %s3529_s17, %s3529_s17, %s3530_s18  }
   0x8   :  { %s27_s20 = sshll.u32 %s3531_s19, 4  ;;  %s54_s23 = sshll.u32 %s4474_s5, 4  ;;  %s28_s20 = int_to_ptr.vmem [resolvable:$true] %s27_s20  ;;  %s55_s23 = int_to_ptr.hbm [resolvable:$true] %s54_s23 }
   0x9   :  { %30 = dma.hbm_to_vmem [thread:$0]  %s26_s16, 128, %s28_s20, [#allocation3]  }
   0xa   :  { %s69_s25 = sshll.u32 %s4476_s7, 4  ;;  %s3532_s26 = smov [#allocation7]   ;;  %s70_s25 = int_to_ptr.hbm [resolvable:$true] %s69_s25 }
   0xb   :  { %s56_s27 = sshll.u32 %s3532_s26, 4  ;;  %s3533_s0 = smov [#allocation8]   ;;  %s57_s27 = int_to_ptr.vmem [resolvable:$true] %s56_s27 }
   0xc   :  { %62 = dma.hbm_to_vmem [thread:$0]  %s55_s23, 8192, %s57_s27, [#allocation6], %s3529_s17, %s3529_s17, %s3530_s18  }
   0xd   :  { %s71_s28 = sshll.u32 %s3533_s0, 4  ;;  %s3534_s29 = smov 512   ;;  %s72_s28 = int_to_ptr.vmem [resolvable:$true] %s71_s28 }
   0xe   :  { %s3535_s30 = smov 32  }
   0xf   :  { %77 = dma.hbm_to_vmem [thread:$0]  %s70_s25, 1024, %s72_s28, [#allocation9], %s3534_s29, %s3534_s29, %s3535_s30  }
  0x10   :  { %3518 = dma.done.wait [#allocation3], 128  }
  0x11   :  { %3519 = vsyncadd [#allocation3], 4294967168 }
  0x12   :  { %3520 = dma.done.wait [#allocation6], 10240  }
  0x13   :  { %3521 = vsyncadd [#allocation6], 4294957056 }
  0x14   :  { %3522 = dma.done.wait [#allocation9], 1024  }
  0x15   :  { %3523 = vsyncadd [#allocation9], 4294966272  ;;  %v2412_v0 = vld [vmem:[#allocation5 + $0x60] sm:$0xf]  ;;  %v3158_v1 = vld [vmem:[#allocation5 + $0x6c] sm:$0xf0] }
  0x16   :  { %v3156_v2 = vld [vmem:[#allocation5 + $0x64] sm:$0xf]  ;;  %v2413_v3 = vor.u32 %v3158_v1, %v2412_v0  ;;  %v2414_v4 = vld [vmem:[#allocation5 + $0x70] sm:$0xf0]  ;;  %v2420_v5 = vld [vmem:[#allocation5 + $0x68] sm:$0xf] }
  0x17   :  { %v3159_v6 = vld [vmem:[#allocation5 + $0x74] sm:$0xf0]  ;;  %v2417_v7 = vor.u32 %v3156_v2, %v2414_v4  ;;  %v3157_v9 = vld [vmem:[#allocation5 + $0x6c] sm:$0xf]  ;;  %v2422_v10 = vld [vmem:[#allocation5 + $0x78] sm:$0xf0] }
  0x18   :  { %v2421_v8 = vor.u32 %v3159_v6, %v2420_v5  ;;  %v2396_v11 = vld [vmem:[#allocation5 + $0x40] sm:$0xf]  ;;  %211 = vmatpush.bf16.msra.mxu0 %v2413_v3  ;;  %v2425_v12 = vor.u32 %v3157_v9, %v2422_v10  ;;  %v3154_v13 = vld [vmem:[#allocation5 + $0x4c] sm:$0xf0]  ;;  %v3152_v14 = vld [vmem:[#allocation5 + $0x44] sm:$0xf] }
  0x19   :  { %v2398_v15 = vld [vmem:[#allocation5 + $0x50] sm:$0xf0]  ;;  %224 = vmatpush.bf16.msra.mxu1 %v2417_v7  ;;  %v2397_v16 = vor.u32 %v3154_v13, %v2396_v11  ;;  %v2404_v18 = vld [vmem:[#allocation5 + $0x48] sm:$0xf]  ;;  %v3155_v19 = vld [vmem:[#allocation5 + $0x54] sm:$0xf0] }
  0x1a   :  { %237 = vmatpush.bf16.msra.mxu2 %v2421_v8  ;;  %v2401_v17 = vor.u32 %v3152_v14, %v2398_v15  ;;  %v3153_v20 = vld [vmem:[#allocation5 + $0x4c] sm:$0xf]  ;;  %250 = vmatpush.bf16.msra.mxu3 %v2425_v12  ;;  %v2405_v21 = vor.u32 %v3155_v19, %v2404_v18  ;;  %v2406_v22 = vld [vmem:[#allocation5 + $0x58] sm:$0xf0]  ;;  %v2380_v23 = vld [vmem:[#allocation5 + $0x20] sm:$0xf] }
  0x1b   :  { %v3150_v24 = vld [vmem:[#allocation5 + $0x2c] sm:$0xf0]  ;;  %v2409_v25 = vor.u32 %v3153_v20, %v2406_v22  ;;  %v3148_v26 = vld [vmem:[#allocation5 + $0x24] sm:$0xf]  ;;  %v2382_v27 = vld [vmem:[#allocation5 + $0x30] sm:$0xf0] }
  0x1c   :  { %v2388_v28 = vld [vmem:[#allocation5 + $0x28] sm:$0xf]  ;;  %212 = vmatpush.bf16.msra.mxu0 %v2397_v16  ;;  %v2381_v29 = vor.u32 %v3150_v24, %v2380_v23  ;;  %v3151_v30 = vld [vmem:[#allocation5 + $0x34] sm:$0xf0]  ;;  %v3149_v31 = vld [vmem:[#allocation5 + $0x2c] sm:$0xf]  ;;  %v2385_v33 = vor.u32 %v3148_v26, %v2382_v27 }
  0x1d   :  { %v2390_v32 = vld [vmem:[#allocation5 + $0x38] sm:$0xf0]  ;;  %225 = vmatpush.bf16.msra.mxu1 %v2401_v17  ;;  %v2389_v34 = vor.u32 %v3151_v30, %v2388_v28  ;;  %v2364_v35 = vld [vmem:[#allocation5] sm:$0xf]  ;;  %v3146_v36 = vld [vmem:[#allocation5 + $0xc] sm:$0xf0] }
  0x1e   :  { %238 = vmatpush.bf16.msra.mxu2 %v2405_v21  ;;  %v3144_v37 = vld [vmem:[#allocation5 + $0x4] sm:$0xf]  ;;  %251 = vmatpush.bf16.msra.mxu3 %v2409_v25  ;;  %v2393_v38 = vor.u32 %v3149_v31, %v2390_v32  ;;  %v2366_v39 = vld [vmem:[#allocation5 + $0x10] sm:$0xf0]  ;;  %v2372_v40 = vld [vmem:[#allocation5 + $0x8] sm:$0xf]  ;;  %v2365_v44 = vor.u32 %v3146_v36, %v2364_v35 }
  0x1f   :  { %v3147_v41 = vld [vmem:[#allocation5 + $0x14] sm:$0xf0]  ;;  %v3145_v42 = vld [vmem:[#allocation5 + $0xc] sm:$0xf]  ;;  %v2374_v43 = vld [vmem:[#allocation5 + $0x18] sm:$0xf0]  ;;  %v2369_v46 = vor.u32 %v3144_v37, %v2366_v39 }
  0x20   :  { %213 = vmatpush.bf16.msra.mxu0 %v2381_v29  ;;  %v95_v45 = vld [vmem:[#allocation2] sm:$0xff]  ;;  %v2373_v47 = vor.u32 %v3147_v41, %v2372_v40  ;;  %v2377_v48 = vor.u32 %v3145_v42, %v2374_v43  ;;  %vm203_vm0 = vcmask 523264   ;;  %v2488_v52 = vld [vmem:[%s4471_s2 + $0x70] sm:$0xf]  ;;  %v3175_v53 = vld [vmem:[%s4471_s2 + $0x74] sm:$0xf0] }
  0x21   :  { %226 = vmatpush.bf16.msra.mxu1 %v2385_v33  ;;  %v96_v49 = vpack.c.bf16 %v95_v45, %v95_v45  ;;  %v3604_v50 = vld [vmem:[#allocation8] ss:$8 sm:$0xf]  ;;  %v2489_v55 = vor.u32 %v3175_v53, %v2488_v52  ;;  %vm386_vm9 = vcmask 1040384   ;;  %vm388_vm11 = vcmask 1042434   ;;  %s2345_s11 = sshll.u32 %s4478_s9, 4  ;;  %s2346_s11 = int_to_ptr.hbm [resolvable:$true] %s2345_s11 }
  0x22   :  { %239 = vmatpush.bf16.msra.mxu2 %v2389_v34  ;;  %252 = vmatpush.bf16.msra.mxu3 %v2393_v38  ;;  %v115_v51 = vperm.slane %v3604_v50, 0  ;;  %v2552_v54 = vld [vmem:[%s4471_s2 + $0xf0] sm:$0xf]  ;;  %v3191_v56 = vld [vmem:[%s4471_s2 + $0xf4] sm:$0xf0]  ;;  %v116_v59 = vperm.slane %v3604_v50, 1 }
  0x23   :  { %v2616_v57 = vld [vmem:[%s4471_s2 + $0x170] sm:$0xf]  ;;  %v3207_v58 = vld [vmem:[%s4471_s2 + $0x174] sm:$0xf0]  ;;  %v2553_v60 = vor.u32 %v3191_v56, %v2552_v54  ;;  %v2480_v2 = vld [vmem:[%s4471_s2 + $0x60] sm:$0xf] }
  0x24   :  { %214 = vmatpush.bf16.msra.mxu0 %v2365_v44  ;;  %v2617_v61 = vor.u32 %v3207_v58, %v2616_v57  ;;  %v2680_v62 = vld [vmem:[%s4471_s2 + $0x1f0] sm:$0xf]  ;;  %v3223_v63 = vld [vmem:[%s4471_s2 + $0x1f4] sm:$0xf0]  ;;  %v3173_v3 = vld [vmem:[%s4471_s2 + $0x64] sm:$0xf0] }
  0x25   :  { %227 = vmatpush.bf16.msra.mxu1 %v2369_v46  ;;  %v2681_v0 = vor.u32 %v3223_v63, %v2680_v62  ;;  %v2544_v4 = vld [vmem:[%s4471_s2 + $0xe0] sm:$0xf]  ;;  %v2481_v7 = vor.u32 %v3173_v3, %v2480_v2  ;;  %v3189_v8 = vld [vmem:[%s4471_s2 + $0xe4] sm:$0xf0]  ;;  %v117_v21 = vperm.slane %v3604_v50, 2  ;;  %v118_v26 = vperm.slane %v3604_v50, 3 }
  0x26   :  { %240 = vmatpush.bf16.msra.mxu2 %v2373_v47  ;;  %253 = vmatpush.bf16.msra.mxu3 %v2377_v48  ;;  %v2608_v9 = vld [vmem:[%s4471_s2 + $0x160] sm:$0xf]  ;;  %v3205_v10 = vld [vmem:[%s4471_s2 + $0x164] sm:$0xf0]  ;;  %v2545_v12 = vor.u32 %v3189_v8, %v2544_v4  ;;  %v2472_v22 = vld [vmem:[%s4471_s2 + $0x50] sm:$0xf] }
  0x27   :  { %2426 = vmatmul.msk.bf16.vlgmr.msra.gmra.mxu0 %vm203_vm0, %v96_v49  ;;  %v2609_v13 = vor.u32 %v3205_v10, %v2608_v9  ;;  %v2672_v14 = vld [vmem:[%s4471_s2 + $0x1e0] sm:$0xf]  ;;  %v3221_v15 = vld [vmem:[%s4471_s2 + $0x1e4] sm:$0xf0]  ;;  %v3171_v23 = vld [vmem:[%s4471_s2 + $0x54] sm:$0xf0] }
  0x28   :  { %2427 = vmatmul.msk.bf16.vlgmr.msra.gmra.mxu1 %vm203_vm0, %v96_v49  ;;  %835 = vmatpush.bf16.msrb.mxu0 %v2489_v55  ;;  %v2673_v18 = vor.u32 %v3221_v15, %v2672_v14  ;;  %v2473_v27 = vor.u32 %v3171_v23, %v2472_v22  ;;  %v2536_v28 = vld [vmem:[%s4471_s2 + $0xd0] sm:$0xf]  ;;  %v3187_v29 = vld [vmem:[%s4471_s2 + $0xd4] sm:$0xf0]  ;;  %v2464_v47 = vld [vmem:[%s4471_s2 + $0x40] sm:$0xf] }
  0x29   :  { %2428 = vmatmul.msk.bf16.vlgmr.msra.gmra.mxu2 %vm203_vm0, %v96_v49  ;;  %2429 = vmatmul.msk.bf16.vlgmr.msra.gmra.mxu3 %vm203_vm0, %v96_v49  ;;  %v2537_v32 = vor.u32 %v3187_v29, %v2536_v28  ;;  %v2600_v33 = vld [vmem:[%s4471_s2 + $0x150] sm:$0xf]  ;;  %v3203_v34 = vld [vmem:[%s4471_s2 + $0x154] sm:$0xf0]  ;;  %v3169_v48 = vld [vmem:[%s4471_s2 + $0x44] sm:$0xf0] }
  0x2a   :  { %848 = vmatpush.bf16.msrb.mxu1 %v2553_v60  ;;  %861 = vmatpush.bf16.msrb.mxu2 %v2617_v61  ;;  %v2601_v38 = vor.u32 %v3203_v34, %v2600_v33  ;;  %v2664_v39 = vld [vmem:[%s4471_s2 + $0x1d0] sm:$0xf]  ;;  %v3219_v40 = vld [vmem:[%s4471_s2 + $0x1d4] sm:$0xf0]  ;;  %v2465_v53 = vor.u32 %v3169_v48, %v2464_v47  ;;  %v3185_v2 = vld [vmem:[%s4471_s2 + $0xc4] sm:$0xf0] }
  0x2b   :  { %874 = vmatpush.bf16.msrb.mxu3 %v2681_v0  ;;  %v2665_v46 = vor.u32 %v3219_v40, %v2664_v39  ;;  %v3201_v8 = vld [vmem:[%s4471_s2 + $0x144] sm:$0xf0]  ;;  %v2656_v14 = vld [vmem:[%s4471_s2 + $0x1c0] sm:$0xf]  ;;  %v2520_v23 = vld [vmem:[%s4471_s2 + $0xb0] sm:$0xf] }
  0x2c   :  { %836 = vmatpush.bf16.msrb.mxu0 %v2481_v7  ;;  %v2592_v7 = vld [vmem:[%s4471_s2 + $0x140] sm:$0xf]  ;;  %v3217_v15 = vld [vmem:[%s4471_s2 + $0x1c4] sm:$0xf0]  ;;  %v3215_v33 = vld [vmem:[%s4471_s2 + $0x1b4] sm:$0xf0] }
  0x2d   :  { %v3165_v39 = vld [vmem:[%s4471_s2 + $0x24] sm:$0xf0]  ;;  %vm390_vm12 = vcmask 1041408   ;;  %s3537_s12 = smov [#allocation10]   ;;  %s2334_s15 = sshll.u32 %s4477_s8, 4  ;;  %s2335_s15 = int_to_ptr.hbm [resolvable:$true] %s2334_s15 }
  0x2e   :  { %849 = vmatpush.bf16.msrb.mxu1 %v2545_v12  ;;  %862 = vmatpush.bf16.msrb.mxu2 %v2609_v13  ;;  %s2332_s13 = sshll.u32 %s3537_s12, 4  ;;  %s2333_s13 = int_to_ptr.vmem [resolvable:$true] %s2332_s13 }
  0x2f   :  { %875 = vmatpush.bf16.msrb.mxu3 %v2673_v18 }
  0x30   :  { %837 = vmatpush.bf16.msrb.mxu0 %v2473_v27 }
  0x32   :  { %850 = vmatpush.bf16.msrb.mxu1 %v2537_v32  ;;  %863 = vmatpush.bf16.msrb.mxu2 %v2601_v38  ;;  %v2648_v32 = vld [vmem:[%s4471_s2 + $0x1b0] sm:$0xf]  ;;  %v2448_v38 = vld [vmem:[%s4471_s2 + $0x20] sm:$0xf] }
  0x33   :  { %876 = vmatpush.bf16.msrb.mxu3 %v2665_v46  ;;  %v3181_v46 = vld [vmem:[%s4471_s2 + $0xa4] sm:$0xf0] }
  0x34   :  { %838 = vmatpush.bf16.msrb.mxu0 %v2465_v53  ;;  %v3197_v53 = vld [vmem:[%s4471_s2 + $0x124] sm:$0xf0] }
  0xa4   :  { %v216_v1 = vpop.f32.mrf.mxu0 }
  0xa5   :  { %v3641_v5 = vadd.f32 %v216_v1, %v115_v51  ;;  %v229_v6 = vpop.f32.mrf.mxu1  ;;  %v2528_v1 = vld [vmem:[%s4471_s2 + $0xc0] sm:$0xf] }
  0xa6   :  { %v3652_v11 = vadd.f32 %v229_v6, %v116_v59  ;;  %v2529_v22 = vor.u32 %v3185_v2, %v2528_v1  ;;  %v3163_v1 = vld [vmem:[%s4471_s2 + $0x14] sm:$0xf0] }
  0xa7   :  { %v263_v16 = vrot.slane %v3641_v5, 4  ;;  %v287_v17 = vmul.f32 %v3641_v5, %v3641_v5 }
  0xa8   :  { %v269_v19 = vrot.slane %v3652_v11, 4  ;;  %v288_v20 = vmul.f32 %v3652_v11, %v3652_v11  ;;  %851 = vmatpush.bf16.msrb.mxu1 %v2529_v22  ;;  %v2632_v22 = vld [vmem:[%s4471_s2 + $0x190] sm:$0xf] }
  0xa9   :  { %v264_v24 = vadd.f32 %v263_v16, %v3641_v5  ;;  %v291_v25 = vrot.slane %v287_v17, 4  ;;  %v2456_v16 = vld [vmem:[%s4471_s2 + $0x30] sm:$0xf] }
  0xaa   :  { %v270_v30 = vadd.f32 %v269_v19, %v3652_v11  ;;  %v297_v31 = vrot.slane %v288_v20, 4 }
  0xab   :  { %v265_v35 = vrot.slane %v264_v24, 2  ;;  %v292_v36 = vadd.f32 %v291_v25, %v287_v17  ;;  %v3167_v17 = vld [vmem:[%s4471_s2 + $0x34] sm:$0xf0] }
  0xac   :  { %v242_v37 = vpop.f32.mrf.mxu2  ;;  %v271_v41 = vrot.slane %v270_v30, 2  ;;  %v298_v42 = vadd.f32 %v297_v31, %v288_v20  ;;  %v255_v44 = vpop.f32.mrf.mxu3  ;;  %v3199_v31 = vld [vmem:[%s4471_s2 + $0x134] sm:$0xf0] }
  0xad   :  { %v3694_v43 = vadd.f32 %v242_v37, %v117_v21  ;;  %v218_v45 = vpop.f32.mrf.mxu0  ;;  %v266_v49 = vadd.f32 %v265_v35, %v264_v24  ;;  %v293_v50 = vrot.slane %v292_v36, 2  ;;  %v3702_v51 = vadd.f32 %v255_v44, %v118_v26  ;;  %v231_v52 = vpop.f32.mrf.mxu1  ;;  %v3183_v24 = vld [vmem:[%s4471_s2 + $0xb4] sm:$0xf0] }
  0xae   :  { %v272_v54 = vadd.f32 %v271_v41, %v270_v30  ;;  %v299_v55 = vrot.slane %v298_v42, 2  ;;  %v2584_v30 = vld [vmem:[%s4471_s2 + $0x130] sm:$0xf]  ;;  %v2593_v37 = vor.u32 %v3201_v8, %v2592_v7  ;;  %v2512_v45 = vld [vmem:[%s4471_s2 + $0xa0] sm:$0xf]  ;;  %v2449_v7 = vor.u32 %v3165_v39, %v2448_v38 }
  0xaf   :  { %v275_v56 = vrot.slane %v3694_v43, 4  ;;  %v289_v57 = vmul.f32 %v3694_v43, %v3694_v43  ;;  %v267_v58 = vrot.slane %v266_v49, 1  ;;  %v281_v59 = vrot.slane %v3702_v51, 4  ;;  %v2576_v52 = vld [vmem:[%s4471_s2 + $0x120] sm:$0xf] }
  0xb0   :  { %v290_v60 = vmul.f32 %v3702_v51, %v3702_v51  ;;  %v273_v61 = vrot.slane %v272_v54, 1  ;;  %v300_v62 = vadd.f32 %v299_v55, %v298_v42  ;;  %v3717_v3 = vadd.f32 %v293_v50, %v292_v36  ;;  %864 = vmatpush.bf16.msrb.mxu2 %v2593_v37  ;;  %v2504_v8 = vld [vmem:[%s4471_s2 + $0x90] sm:$0xf]  ;;  %v3193_v37 = vld [vmem:[%s4471_s2 + $0x104] sm:$0xf0] }
  0xb1   :  { %v276_v63 = vadd.f32 %v275_v56, %v3694_v43  ;;  %v303_v0 = vrot.slane %v289_v57, 4  ;;  %v282_v4 = vadd.f32 %v281_v59, %v3702_v51  ;;  %v3738_v18 = vadd.f32 %v267_v58, %v266_v49  ;;  %v2640_v58 = vld [vmem:[%s4471_s2 + $0x1a0] sm:$0xf]  ;;  %v3213_v59 = vld [vmem:[%s4471_s2 + $0x1a4] sm:$0xf0] }
  0xb2   :  { %v309_v6 = vrot.slane %v290_v60, 4  ;;  %v274_v9 = vadd.f32 %v273_v61, %v272_v54  ;;  %v301_v10 = vrot.slane %v300_v62, 1  ;;  %v295_v34 = vrot.slane %v3717_v3, 1  ;;  %v3174_v38 = vld [vmem:[%s4471_s2 + $0x74] sm:$0xf] }
  0xb3   :  { %v277_v12 = vrot.slane %v276_v63, 2  ;;  %v304_v13 = vadd.f32 %v303_v0, %v289_v57  ;;  %v283_v19 = vrot.slane %v282_v4, 2  ;;  %v2657_v49 = vor.u32 %v3217_v15, %v2656_v14  ;;  %v2440_v0 = vld [vmem:[%s4471_s2 + $0x10] sm:$0xf] }
  0xb4   :  { %v310_v20 = vadd.f32 %v309_v6, %v290_v60  ;;  %v244_v21 = vpop.f32.mrf.mxu2  ;;  %v302_v25 = vadd.f32 %v301_v10, %v300_v62  ;;  %v3746_v26 = vmul.f32 0.125, %v274_v9  ;;  %v257_v29 = vpop.f32.mrf.mxu3  ;;  %v2457_v50 = vor.u32 %v3167_v17, %v2456_v16  ;;  %v3179_v9 = vld [vmem:[%s4471_s2 + $0x94] sm:$0xf0]  ;;  %v2568_v15 = vld [vmem:[%s4471_s2 + $0x110] sm:$0xf] }
  0xb5   :  { %v278_v27 = vadd.f32 %v277_v12, %v276_v63  ;;  %v305_v28 = vrot.slane %v304_v13, 2  ;;  %v284_v35 = vadd.f32 %v283_v19, %v282_v4  ;;  %v2521_v57 = vor.u32 %v3183_v24, %v2520_v23  ;;  %877 = vmatpush.bf16.msrb.mxu3 %v2657_v49  ;;  %v3195_v16 = vld [vmem:[%s4471_s2 + $0x114] sm:$0xf0] }
  0xb6   :  { %v311_v36 = vrot.slane %v310_v20, 2  ;;  %v320_v40 = vmul.f32 0.125, %v302_v25  ;;  %v324_v41 = vmul.f32 %v3746_v26, %v3746_v26  ;;  %839 = vmatpush.bf16.msrb.mxu0 %v2457_v50  ;;  %v2585_v62 = vor.u32 %v3199_v31, %v2584_v30  ;;  %v3161_v31 = vld [vmem:[%s4471_s2 + $0x4] sm:$0xf0]  ;;  %v2554_v50 = vld [vmem:[%s4471_s2 + $0xf8] sm:$0xf0] }
  0xb7   :  { %v279_v42 = vrot.slane %v278_v27, 1  ;;  %v306_v44 = vadd.f32 %v305_v28, %v304_v13  ;;  %v285_v47 = vrot.slane %v284_v35, 1  ;;  %v2649_v63 = vor.u32 %v3215_v33, %v2648_v32  ;;  %852 = vmatpush.bf16.msrb.mxu1 %v2521_v57  ;;  %v2432_v28 = vld [vmem:[%s4471_s2] sm:$0xf]  ;;  %v3177_v33 = vld [vmem:[%s4471_s2 + $0x84] sm:$0xf0] }
  0xb8   :  { %v312_v48 = vadd.f32 %v311_v36, %v310_v20  ;;  %v328_v54 = vsub.f32 %v320_v40, %v324_v41  ;;  %865 = vmatpush.bf16.msrb.mxu2 %v2585_v62  ;;  %v2513_v13 = vor.u32 %v3181_v46, %v2512_v45  ;;  %v2577_v14 = vor.u32 %v3197_v53, %v2576_v52  ;;  %v2496_v32 = vld [vmem:[%s4471_s2 + $0x80] sm:$0xf]  ;;  %v3209_v41 = vld [vmem:[%s4471_s2 + $0x184] sm:$0xf0]  ;;  %v3206_v52 = vld [vmem:[%s4471_s2 + $0x174] sm:$0xf] }
  0xb9   :  { %v280_v55 = vadd.f32 %v279_v42, %v278_v27  ;;  %v307_v56 = vrot.slane %v306_v44, 1  ;;  %v286_v60 = vadd.f32 %v285_v47, %v284_v35  ;;  %v296_v17 = vadd.f32 %v295_v34, %v3717_v3  ;;  %878 = vmatpush.bf16.msrb.mxu3 %v2649_v63  ;;  %v3211_v3 = vld [vmem:[%s4471_s2 + $0x194] sm:$0xf0]  ;;  %v2560_v36 = vld [vmem:[%s4471_s2 + $0x100] sm:$0xf] }
  0xba   :  { %v313_v61 = vrot.slane %v312_v48, 1  ;;  %v332_v2 = vmax.f32 %v328_v54, 0.0  ;;  %840 = vmatpush.bf16.msrb.mxu0 %v2449_v7  ;;  %v2641_v25 = vor.u32 %v3213_v59, %v2640_v58  ;;  %v2441_v27 = vor.u32 %v3163_v1, %v2440_v0  ;;  %v2624_v40 = vld [vmem:[%s4471_s2 + $0x180] sm:$0xf]  ;;  %v2490_v42 = vld [vmem:[%s4471_s2 + $0x78] sm:$0xf0] }
  0xbb   :  { %v308_v4 = vadd.f32 %v307_v56, %v306_v44  ;;  %v3793_v6 = vmul.f32 0.125, %v280_v55  ;;  %v3801_v12 = vmul.f32 0.125, %v286_v60  ;;  %853 = vmatpush.bf16.msrb.mxu1 %v2513_v13  ;;  %v2505_v30 = vor.u32 %v3179_v9, %v2504_v8  ;;  %v3190_v44 = vld [vmem:[%s4471_s2 + $0xf4] sm:$0xf]  ;;  %v2618_v55 = vld [vmem:[%s4471_s2 + $0x178] sm:$0xf0] }
  0xbc   :  { %v314_v10 = vadd.f32 %v313_v61, %v312_v48  ;;  %v3810_v19 = vadd.f32 1e-05, %v332_v2  ;;  %866 = vmatpush.bf16.msrb.mxu2 %v2577_v14  ;;  %v2569_v35 = vor.u32 %v3195_v16, %v2568_v15  ;;  %v3857_v45 = vmul.f32 0.125, %v3738_v18  ;;  %v3222_v56 = vld [vmem:[%s4471_s2 + $0x1f4] sm:$0xf] }
  0xbd   :  { %v321_v20 = vmul.f32 0.125, %v308_v4  ;;  %v325_v21 = vmul.f32 %v3793_v6, %v3793_v6  ;;  %v326_v24 = vmul.f32 %v3801_v12, %v3801_v12  ;;  %v319_v46 = vmul.f32 0.125, %v296_v17  ;;  %879 = vmatpush.bf16.msrb.mxu3 %v2641_v25  ;;  %v2682_v61 = vld [vmem:[%s4471_s2 + $0x1f8] sm:$0xf0]  ;;  %v3172_v62 = vld [vmem:[%s4471_s2 + $0x64] sm:$0xf] }
  0xbe   :  { %v322_v23 = vmul.f32 0.125, %v314_v10  ;;  %3348 = vrsqrt.f32 %v3810_v19  ;;  %841 = vmatpush.bf16.msrb.mxu0 %v2441_v27  ;;  %v2633_v48 = vor.u32 %v3211_v3, %v2632_v22  ;;  %v2433_v49 = vor.u32 %v3161_v31, %v2432_v28  ;;  %v2482_v1 = vld [vmem:[%s4471_s2 + $0x68] sm:$0xf0]  ;;  %v3188_v2 = vld [vmem:[%s4471_s2 + $0xe4] sm:$0xf] }
  0xbf   :  { %v329_v29 = vsub.f32 %v321_v20, %v325_v21  ;;  %854 = vmatpush.bf16.msrb.mxu1 %v2505_v30  ;;  %v2497_v54 = vor.u32 %v3177_v33, %v2496_v32  ;;  %v2493_v18 = vor.u32 %v3174_v38, %v2490_v42  ;;  %v323_v57 = vmul.f32 %v3857_v45, %v3857_v45  ;;  %v2546_v4 = vld [vmem:[%s4471_s2 + $0xe8] sm:$0xf0]  ;;  %v3204_v9 = vld [vmem:[%s4471_s2 + $0x164] sm:$0xf]  ;;  %v3170_v21 = vld [vmem:[%s4471_s2 + $0x54] sm:$0xf] }
  0xc0   :  { %v330_v34 = vsub.f32 %v322_v23, %v326_v24  ;;  %867 = vmatpush.bf16.msrb.mxu2 %v2569_v35  ;;  %v2561_v59 = vor.u32 %v3193_v37, %v2560_v36  ;;  %v2557_v60 = vor.u32 %v3190_v44, %v2554_v50  ;;  %v2621_v0 = vor.u32 %v3206_v52, %v2618_v55  ;;  %v2610_v10 = vld [vmem:[%s4471_s2 + $0x168] sm:$0xf0]  ;;  %v3220_v15 = vld [vmem:[%s4471_s2 + $0x1e4] sm:$0xf]  ;;  %v2474_v22 = vld [vmem:[%s4471_s2 + $0x58] sm:$0xf0] }
  0xc1   :  { %v333_v39 = vmax.f32 %v329_v29, 0.0  ;;  %880 = vmatpush.bf16.msrb.mxu3 %v2633_v48  ;;  %v2625_v8 = vor.u32 %v3209_v41, %v2624_v40  ;;  %v2685_v13 = vor.u32 %v3222_v56, %v2682_v61  ;;  %v2485_v14 = vor.u32 %v3172_v62, %v2482_v1  ;;  %v2674_v20 = vld [vmem:[%s4471_s2 + $0x1e8] sm:$0xf0]  ;;  %v3186_v24 = vld [vmem:[%s4471_s2 + $0xd4] sm:$0xf] }
  0xc2   :  { %v334_v47 = vmax.f32 %v330_v34, 0.0  ;;  %842 = vmatpush.bf16.msrb.mxu0 %v2433_v49  ;;  %v327_v16 = vsub.f32 %v319_v46, %v323_v57  ;;  %v2549_v17 = vor.u32 %v3188_v2, %v2546_v4  ;;  %v2613_v23 = vor.u32 %v3204_v9, %v2610_v10  ;;  %v2538_v25 = vld [vmem:[%s4471_s2 + $0xd8] sm:$0xf0]  ;;  %v3202_v3 = vld [vmem:[%s4471_s2 + $0x154] sm:$0xf] }
  0xc3   :  { %v3865_v53 = vadd.f32 1e-05, %v333_v39  ;;  %855 = vmatpush.bf16.msrb.mxu1 %v2497_v54  ;;  %v2602_v28 = vld [vmem:[%s4471_s2 + $0x158] sm:$0xf0]  ;;  %v2677_v30 = vor.u32 %v3220_v15, %v2674_v20  ;;  %v2477_v31 = vor.u32 %v3170_v21, %v2474_v22  ;;  %v3218_v32 = vld [vmem:[%s4471_s2 + $0x1d4] sm:$0xf]  ;;  %v2541_v36 = vor.u32 %v3186_v24, %v2538_v25 }
  0xc4   :  { %v3875_v58 = vadd.f32 1e-05, %v334_v47  ;;  %v3883_v63 = vpop.eup %3348  ;;  %868 = vmatpush.bf16.msrb.mxu2 %v2561_v59  ;;  %v331_v33 = vmax.f32 %v327_v16, 0.0  ;;  %v2666_v37 = vld [vmem:[%s4471_s2 + $0x1d8] sm:$0xf0]  ;;  %v2605_v41 = vor.u32 %v3202_v3, %v2602_v28  ;;  %vm355_vm7 = vweird.f32 %v3810_v19 }
  0xc5   :  { %3350 = vrsqrt.f32 %v3865_v53  ;;  %v350_v7 = vmul.f32 %v3883_v63, %v3810_v19  ;;  %881 = vmatpush.bf16.msrb.mxu3 %v2625_v8  ;;  %v3168_v38 = vld [vmem:[%s4471_s2 + $0x44] sm:$0xf]  ;;  %v2466_v39 = vld [vmem:[%s4471_s2 + $0x48] sm:$0xf0]  ;;  %v2669_v52 = vor.u32 %v3218_v32, %v2666_v37  ;;  %vm365_vm2 = vweird.f32 %v3865_v53  ;;  %v2458_v20 = vld [vmem:[%s4471_s2 + $0x38] sm:$0xf0] }
  0xc6   :  { %3352 = vrsqrt.f32 %v3875_v58  ;;  %887 = vmatpush.bf16.msra.mxu0 %v2493_v18  ;;  %v3184_v42 = vld [vmem:[%s4471_s2 + $0xc4] sm:$0xf]  ;;  %v2530_v44 = vld [vmem:[%s4471_s2 + $0xc8] sm:$0xf0]  ;;  %v2469_v54 = vor.u32 %v3168_v38, %v2466_v39  ;;  %v335_v18 = vadd.f32 1e-05, %v331_v33  ;;  %vm356_vm5 = vweird.f32 %v3883_v63 }
  0xc7   :  { %900 = vmatpush.bf16.msra.mxu1 %v2557_v60  ;;  %v351_v27 = vmul.f32 %v3883_v63, %v350_v7  ;;  %v3200_v48 = vld [vmem:[%s4471_s2 + $0x144] sm:$0xf]  ;;  %v2594_v49 = vld [vmem:[%s4471_s2 + $0x148] sm:$0xf0]  ;;  %v2533_v56 = vor.u32 %v3184_v42, %v2530_v44  ;;  %vm375_vm6 = vweird.f32 %v3875_v58  ;;  %vm3992_vm10 = vmor %vm355_vm7, %vm356_vm5  ;;  %vm1191_vm7 = vcmask 130048  }
  0xc8   :  { %913 = vmatpush.bf16.msra.mxu2 %v2621_v0  ;;  %v3216_v57 = vld [vmem:[%s4471_s2 + $0x1c4] sm:$0xf]  ;;  %v2658_v59 = vld [vmem:[%s4471_s2 + $0x1c8] sm:$0xf0]  ;;  %v2597_v61 = vor.u32 %v3200_v48, %v2594_v49  ;;  %3354 = vrsqrt.f32 %v335_v18  ;;  %v3182_v21 = vld [vmem:[%s4471_s2 + $0xb4] sm:$0xf]  ;;  %vm345_vm14 = vweird.f32 %v335_v18 }
  0xc9   :  { %926 = vmatpush.bf16.msra.mxu3 %v2685_v13  ;;  %v352_v46 = vmul.f32 0.5, %v351_v27  ;;  %v2661_v2 = vor.u32 %v3216_v57, %v2658_v59  ;;  %v2522_v24 = vld [vmem:[%s4471_s2 + $0xb8] sm:$0xf0]  ;;  %v3198_v25 = vld [vmem:[%s4471_s2 + $0x134] sm:$0xf] }
  0xca   :  { %888 = vmatpush.bf16.msra.mxu0 %v2485_v14  ;;  %v2586_v27 = vld [vmem:[%s4471_s2 + $0x138] sm:$0xf0]  ;;  %v3164_v33 = vld [vmem:[%s4471_s2 + $0x24] sm:$0xf]  ;;  %v2578_v44 = vld [vmem:[%s4471_s2 + $0x128] sm:$0xf0] }
  0xcb   :  { %v3929_v29 = vpop.eup %3350  ;;  %901 = vmatpush.bf16.msra.mxu1 %v2549_v17  ;;  %v353_v0 = vsub.f32 1.5, %v352_v46  ;;  %v3212_v46 = vld [vmem:[%s4471_s2 + $0x1a4] sm:$0xf]  ;;  %v260_v48 = vld [vmem:[#allocation8 + $0x1] ss:$8 sm:$0xf] }
  0xcc   :  { %v3934_v34 = vpop.eup %3352  ;;  %v360_v35 = vmul.f32 %v3929_v29, %v3865_v53  ;;  %914 = vmatpush.bf16.msra.mxu2 %v2613_v23  ;;  %vm366_vm1 = vweird.f32 %v3929_v29  ;;  %v2506_v59 = vld [vmem:[%s4471_s2 + $0x98] sm:$0xf0]  ;;  %v3160_v7 = vld [vmem:[%s4471_s2 + $0x4] sm:$0xf]  ;;  %v2498_v13 = vld [vmem:[%s4471_s2 + $0x88] sm:$0xf0] }
  0xcd   :  { %v370_v40 = vmul.f32 %v3934_v34, %v3875_v58  ;;  %927 = vmatpush.bf16.msra.mxu3 %v2677_v30  ;;  %vm3972_vm3 = vmor %vm365_vm2, %vm366_vm1  ;;  %vm376_vm4 = vweird.f32 %v3934_v34  ;;  %v354_v53 = vmul.f32 %v3883_v63, %v353_v0  ;;  %v3166_v58 = vld [vmem:[%s4471_s2 + $0x34] sm:$0xf]  ;;  %v2589_v30 = vor.u32 %v3198_v25, %v2586_v27  ;;  %v3192_v15 = vld [vmem:[%s4471_s2 + $0x104] sm:$0xf] }
  0xce   :  { %v361_v47 = vmul.f32 %v3929_v29, %v360_v35  ;;  %889 = vmatpush.bf16.msra.mxu0 %v2477_v31  ;;  %v3982_v10 = vpop.eup %3354  ;;  %vm3987_vm8 = vmor %vm375_vm6, %vm376_vm4  ;;  %v2461_v23 = vor.u32 %v3166_v58, %v2458_v20  ;;  %v2650_v31 = vld [vmem:[%s4471_s2 + $0x1b8] sm:$0xf0]  ;;  %v3180_v35 = vld [vmem:[%s4471_s2 + $0xa4] sm:$0xf] }
  0xcf   :  { %v371_v50 = vmul.f32 %v3934_v34, %v370_v40  ;;  %902 = vmatpush.bf16.msra.mxu1 %v2541_v36  ;;  %v340_v14 = vmul.f32 %v3982_v10, %v335_v18  ;;  %vm346_vm13 = vweird.f32 %v3982_v10  ;;  %v358_v22 = vsel %vm3992_vm10, %v3883_v63, %v354_v53  ;;  %v3214_v63 = vld [vmem:[%s4471_s2 + $0x1b4] sm:$0xf]  ;;  %v2514_v40 = vld [vmem:[%s4471_s2 + $0xa8] sm:$0xf0]  ;;  %v2442_v18 = vld [vmem:[%s4471_s2 + $0x18] sm:$0xf0] }
  0xd0   :  { %v362_v55 = vmul.f32 0.5, %v361_v47  ;;  %915 = vmatpush.bf16.msra.mxu2 %v2605_v41  ;;  %v2653_v32 = vor.u32 %v3214_v63, %v2650_v31  ;;  %vm4039_vm15 = vmor %vm345_vm14, %vm346_vm13  ;;  %v383_v38 = vrot.slane %v358_v22, 7  ;;  %v3196_v41 = vld [vmem:[%s4471_s2 + $0x124] sm:$0xf]  ;;  %v2517_v42 = vor.u32 %v3180_v35, %v2514_v40  ;;  %v2642_v47 = vld [vmem:[%s4471_s2 + $0x1a8] sm:$0xf0] }
  0xd1   :  { %v372_v60 = vmul.f32 0.5, %v371_v50  ;;  %928 = vmatpush.bf16.msra.mxu3 %v2669_v52  ;;  %v341_v19 = vmul.f32 %v3982_v10, %v340_v14  ;;  %v2581_v50 = vor.u32 %v3196_v41, %v2578_v44  ;;  %v2645_v52 = vor.u32 %v3212_v46, %v2642_v47  ;;  %v3176_v53 = vld [vmem:[%s4471_s2 + $0x84] sm:$0xf]  ;;  %v2626_v20 = vld [vmem:[%s4471_s2 + $0x188] sm:$0xf0] }
  0xd2   :  { %v363_v62 = vsub.f32 1.5, %v362_v55  ;;  %890 = vmatpush.bf16.msra.mxu0 %v2469_v54  ;;  %v3162_v54 = vld [vmem:[%s4471_s2 + $0x14] sm:$0xf] }
  0xd3   :  { %v373_v1 = vsub.f32 1.5, %v372_v60  ;;  %903 = vmatpush.bf16.msra.mxu1 %v2533_v56  ;;  %v342_v3 = vmul.f32 0.5, %v341_v19  ;;  %v3178_v55 = vld [vmem:[%s4471_s2 + $0x94] sm:$0xf]  ;;  %v2445_v57 = vor.u32 %v3162_v54, %v2442_v18 }
  0xd4   :  { %v364_v4 = vmul.f32 %v3929_v29, %v363_v62  ;;  %916 = vmatpush.bf16.msra.mxu2 %v2597_v61  ;;  %v3194_v60 = vld [vmem:[%s4471_s2 + $0x114] sm:$0xf]  ;;  %v2570_v61 = vld [vmem:[%s4471_s2 + $0x118] sm:$0xf0]  ;;  %v2509_v0 = vor.u32 %v3178_v55, %v2506_v59 }
  0xd5   :  { %v374_v8 = vmul.f32 %v3934_v34, %v373_v1  ;;  %929 = vmatpush.bf16.msra.mxu3 %v2661_v2  ;;  %v343_v36 = vsub.f32 1.5, %v342_v3  ;;  %v2573_v1 = vor.u32 %v3194_v60, %v2570_v61  ;;  %v3210_v2 = vld [vmem:[%s4471_s2 + $0x194] sm:$0xf] }
  0xd6   :  { %v368_v9 = vsel %vm3972_vm3, %v3929_v29, %v364_v4  ;;  %v2525_v29 = vor.u32 %v3182_v21, %v2522_v24  ;;  %891 = vmatpush.bf16.msra.mxu0 %v2461_v23  ;;  %v2634_v4 = vld [vmem:[%s4471_s2 + $0x198] sm:$0xf0]  ;;  %v2501_v21 = vor.u32 %v3176_v53, %v2498_v13 }
  0xd7   :  { %v378_v16 = vsel %vm3987_vm8, %v3934_v34, %v374_v8  ;;  %v384_v17 = vrot.slane %v368_v9, 6  ;;  %v2450_v34 = vld [vmem:[%s4471_s2 + $0x28] sm:$0xf0]  ;;  %v344_v49 = vmul.f32 %v3982_v10, %v343_v36  ;;  %v2637_v9 = vor.u32 %v3210_v2, %v2634_v4 }
  0xd8   :  { %v385_v28 = vrot.slane %v378_v16, 5  ;;  %904 = vmatpush.bf16.msra.mxu1 %v2525_v29  ;;  %917 = vmatpush.bf16.msra.mxu2 %v2589_v30  ;;  %v2453_v39 = vor.u32 %v3164_v33, %v2450_v34  ;;  %v2562_v16 = vld [vmem:[%s4471_s2 + $0x108] sm:$0xf0]  ;;  %v262_v34 = vld [vmem:[#allocation8 + $0x2] ss:$8 sm:$0xf] }
  0xd9   :  { %930 = vmatpush.bf16.msra.mxu3 %v2653_v32  ;;  %v348_v62 = vsel %vm4039_vm15, %v3982_v10, %v344_v49  ;;  %v2434_v10 = vld [vmem:[%s4471_s2 + $0x8] sm:$0xf0]  ;;  %v2565_v22 = vor.u32 %v3192_v15, %v2562_v16 }
  0xda   :  { %v389_v56 = vsel %vm388_vm11, %v384_v17, %v385_v28  ;;  %892 = vmatpush.bf16.msra.mxu0 %v2453_v39  ;;  %v387_v8 = vsel %vm386_vm9, %v348_v62, %v383_v38  ;;  %v3208_v17 = vld [vmem:[%s4471_s2 + $0x184] sm:$0xf]  ;;  %v2437_v58 = vor.u32 %v3160_v7, %v2434_v10 }
  0xdb   :  { %v391_v14 = vsel %vm390_vm12, %v387_v8, %v389_v56  ;;  %v2629_v23 = vor.u32 %v3208_v17, %v2626_v20 }
  0xdc   :  { %905 = vmatpush.bf16.msra.mxu1 %v2517_v42  ;;  %918 = vmatpush.bf16.msra.mxu2 %v2581_v50  ;;  %v393_v19 = vmul.f32 %v391_v14, %v260_v48 }
  0xdd   :  { %931 = vmatpush.bf16.msra.mxu3 %v2645_v52 }
  0xde   :  { %893 = vmatpush.bf16.msra.mxu0 %v2445_v57  ;;  %v395_v24 = vperm.slane %v393_v19, 0  ;;  %v396_v25 = vperm.slane %v393_v19, 1  ;;  %v397_v27 = vperm.slane %v393_v19, 2  ;;  %v398_v3 = vperm.slane %v393_v19, 3 }
  0xe0   :  { %906 = vmatpush.bf16.msra.mxu1 %v2509_v0  ;;  %919 = vmatpush.bf16.msra.mxu2 %v2573_v1  ;;  %v404_v28 = vmul.f32 %v396_v25, %v3746_v26  ;;  %v405_v29 = vmul.f32 %v397_v27, %v3793_v6  ;;  %v406_v30 = vmul.f32 %v398_v3, %v3801_v12 }
  0xe1   :  { %932 = vmatpush.bf16.msra.mxu3 %v2637_v9  ;;  %v403_v63 = vmul.f32 %v395_v24, %v3857_v45  ;;  %v419_v6 = vmul.f32 %v395_v24, %v3641_v5  ;;  %v420_v12 = vmul.f32 %v396_v25, %v3652_v11  ;;  %v421_v38 = vmul.f32 %v397_v27, %v3694_v43  ;;  %v509_v43 = vld [vmem:[#allocation8 + $0x3] ss:$8 sm:$0x3] }
  0xe2   :  { %894 = vmatpush.bf16.msra.mxu0 %v2437_v58  ;;  %v411_v31 = vrot.slane %v404_v28, 7  ;;  %v412_v32 = vrot.slane %v405_v29, 6  ;;  %v413_v33 = vrot.slane %v406_v30, 5  ;;  %v422_v45 = vmul.f32 %v398_v3, %v3702_v51 }
  0xe3   :  { %v511_v51 = vperm.slane %v509_v43, 0  ;;  %v512_v53 = vperm.slane %v509_v43, 1  ;;  %v3229_v43 = vld [vmem:[%s4472_s3 + $0x28] sm:$0xff] }
  0xe4   :  { %907 = vmatpush.bf16.msra.mxu1 %v2501_v21  ;;  %920 = vmatpush.bf16.msra.mxu2 %v2565_v22  ;;  %v414_v35 = vsel %vm386_vm9, %v403_v63, %v411_v31  ;;  %v415_v36 = vsel %vm388_vm11, %v412_v32, %v413_v33 }
  0xe5   :  { %933 = vmatpush.bf16.msra.mxu3 %v2629_v23  ;;  %v416_v26 = vsel %vm390_vm12, %v414_v35, %v415_v36 }
  0xe6   :  { %v418_v37 = vsub.f32 %v262_v34, %v416_v26 }
  0xe8   :  { %v424_v39 = vperm.slane %v418_v37, 0  ;;  %v425_v40 = vperm.slane %v418_v37, 1  ;;  %v426_v41 = vperm.slane %v418_v37, 2  ;;  %v427_v42 = vperm.slane %v418_v37, 3 }
  0xea   :  { %v432_v44 = vadd.f32 %v424_v39, %v419_v6  ;;  %v433_v46 = vadd.f32 %v425_v40, %v420_v12  ;;  %v434_v47 = vadd.f32 %v426_v41, %v421_v38  ;;  %v435_v48 = vadd.f32 %v427_v42, %v422_v45  ;;  %v3231_v42 = vld [vmem:[%s4472_s3 + $0x38] sm:$0xff] }
  0xec   :  { %v436_v49 = vmax.f32 %v432_v44, 0.0  ;;  %v437_v50 = vmax.f32 %v433_v46, 0.0  ;;  %v438_v52 = vmax.f32 %v434_v47, 0.0  ;;  %v439_v54 = vmax.f32 %v435_v48, 0.0  ;;  %v3239_v44 = vld [vmem:[%s4472_s3 + $0x78] sm:$0xff] }
  0xee   :  { %v440_v18 = vpack.c.bf16 %v436_v49, %v436_v49  ;;  %v441_v5 = vpack.c.bf16 %v437_v50, %v437_v50  ;;  %v442_v55 = vpack.c.bf16 %v438_v52, %v438_v52  ;;  %v443_v11 = vpack.c.bf16 %v439_v54, %v439_v54  ;;  %v3230_v52 = vld [vmem:[%s4472_s3 + $0x30] sm:$0xff] }
  0xef   :  { %v3238_v54 = vld [vmem:[%s4472_s3 + $0x70] sm:$0xff] }
  0xf0   :  { %843 = vmatmul.bf16.vlgmr.msrb.gmra.mxu0 %v440_v18  ;;  %856 = vmatmul.bf16.vlgmr.msrb.gmra.mxu1 %v441_v5 }
  0xf1   :  { %869 = vmatmul.bf16.vlgmr.msrb.gmra.mxu2 %v442_v55  ;;  %882 = vmatmul.bf16.vlgmr.msrb.gmra.mxu3 %v443_v11 }
  0xf2   :  { %1162 = vmatpush.bf16.msrb.mxu0 %v3231_v42  ;;  %1175 = vmatpush.bf16.msrb.mxu1 %v3239_v44 }
  0xf6   :  { %1163 = vmatpush.bf16.msrb.mxu0 %v3230_v52  ;;  %1176 = vmatpush.bf16.msrb.mxu1 %v3238_v54  ;;  %v1065_v54 = vld [vmem:[#allocation8 + $0x6] ss:$0 sm:$0xff] }
  0xfa   :  { %1164 = vmatpush.bf16.msrb.mxu0 %v3229_v43 }
 0x100   :  { %895 = vmatmul.bf16.vlgmr.msra.gmra.mxu0 %v440_v18  ;;  %908 = vmatmul.bf16.vlgmr.msra.gmra.mxu1 %v441_v5 }
 0x101   :  { %921 = vmatmul.bf16.vlgmr.msra.gmra.mxu2 %v442_v55  ;;  %934 = vmatmul.bf16.vlgmr.msra.gmra.mxu3 %v443_v11 }
 0x16d   :  { %v844_v56 = vpop.f32.mrf.mxu0  ;;  %v857_v57 = vpop.f32.mrf.mxu1 }
 0x16e   :  { %v845_v59 = vadd.f32 %v844_v56, %v511_v51  ;;  %v3237_v51 = vld [vmem:[%s4472_s3 + $0x68] sm:$0xff] }
 0x16f   :  { %1177 = vmatpush.bf16.msrb.mxu1 %v3237_v51 }
 0x170   :  { %v858_v60 = vadd.f32 %v857_v57, %v845_v59 }
 0x174   :  { %v870_v61 = vpop.f32.mrf.mxu2  ;;  %v883_v62 = vpop.f32.mrf.mxu3 }
 0x175   :  { %v871_v0 = vadd.f32 %v870_v61, %v858_v60  ;;  %v846_v1 = vpop.f32.mrf.mxu0  ;;  %v859_v2 = vpop.f32.mrf.mxu1  ;;  %v3228_v60 = vld [vmem:[%s4472_s3 + $0x20] sm:$0xff] }
 0x176   :  { %v3236_v61 = vld [vmem:[%s4472_s3 + $0x60] sm:$0xff]  ;;  %1165 = vmatpush.bf16.msrb.mxu0 %v3228_v60  ;;  %v3227_v1 = vld [vmem:[%s4472_s3 + $0x18] sm:$0xff] }
 0x177   :  { %v4124_v4 = vadd.f32 %v883_v62, %v871_v0  ;;  %1178 = vmatpush.bf16.msrb.mxu1 %v3236_v61  ;;  %v3235_v2 = vld [vmem:[%s4472_s3 + $0x58] sm:$0xff]  ;;  %v1197_v61 = vld [vmem:[#allocation8 + $0x20] ss:$8 sm:$0x3] }
 0x179   :  { %v943_v7 = vrot.slane %v4124_v4, 4  ;;  %v955_v8 = vmul.f32 %v4124_v4, %v4124_v4 }
 0x17a   :  { %1166 = vmatpush.bf16.msrb.mxu0 %v3227_v1  ;;  %v3002_v1 = vld [vmem:[#allocation7 + $0x1e0] sm:$0xf] }
 0x17b   :  { %v944_v9 = vadd.f32 %v943_v7, %v4124_v4  ;;  %v957_v10 = vrot.slane %v955_v8, 4  ;;  %1179 = vmatpush.bf16.msrb.mxu1 %v3235_v2 }
 0x17c   :  { %v872_v13 = vpop.f32.mrf.mxu2  ;;  %v885_v14 = vpop.f32.mrf.mxu3 }
 0x17d   :  { %v945_v15 = vrot.slane %v944_v9, 2  ;;  %v958_v16 = vadd.f32 %v957_v10, %v955_v8  ;;  %v896_v17 = vpop.f32.mrf.mxu0  ;;  %v909_v19 = vpop.f32.mrf.mxu1  ;;  %v3234_v10 = vld [vmem:[%s4472_s3 + $0x50] sm:$0xff]  ;;  %v3225_v13 = vld [vmem:[%s4472_s3 + $0x8] sm:$0xff] }
 0x17e   :  { %v897_v21 = vadd.f32 %v896_v17, %v512_v53  ;;  %v3233_v14 = vld [vmem:[%s4472_s3 + $0x48] sm:$0xff] }
 0x17f   :  { %v946_v58 = vadd.f32 %v945_v15, %v944_v9  ;;  %v959_v20 = vrot.slane %v958_v16, 2  ;;  %v3226_v9 = vld [vmem:[%s4472_s3 + $0x10] sm:$0xff]  ;;  %1180 = vmatpush.bf16.msrb.mxu1 %v3234_v10 }
 0x180   :  { %v910_v27 = vadd.f32 %v909_v19, %v897_v21  ;;  %1167 = vmatpush.bf16.msrb.mxu0 %v3226_v9  ;;  %v3224_v19 = vld [vmem:[%s4472_s3] sm:$0xff]  ;;  %v2876_v9 = vld [vmem:[#allocation7 + $0xf0] sm:$0xf0] }
 0x181   :  { %v947_v22 = vrot.slane %v946_v58, 1  ;;  %v960_v23 = vadd.f32 %v959_v20, %v958_v16 }
 0x183   :  { %v948_v24 = vadd.f32 %v947_v22, %v946_v58  ;;  %v961_v25 = vrot.slane %v960_v23, 1  ;;  %1181 = vmatpush.bf16.msrb.mxu1 %v3233_v14  ;;  %v3232_v58 = vld [vmem:[%s4472_s3 + $0x40] sm:$0xff]  ;;  %v3004_v14 = vld [vmem:[#allocation7 + $0x1f0] sm:$0xf0] }
 0x184   :  { %v922_v3 = vpop.f32.mrf.mxu2  ;;  %v935_v28 = vpop.f32.mrf.mxu3  ;;  %1168 = vmatpush.bf16.msrb.mxu0 %v3225_v13  ;;  %v3302_v13 = vld [vmem:[#allocation7 + $0x1e4] sm:$0xf] }
 0x185   :  { %v962_v29 = vadd.f32 %v961_v25, %v960_v23  ;;  %v4130_v30 = vmul.f32 0.125, %v948_v24  ;;  %v923_v63 = vadd.f32 %v922_v3, %v910_v27  ;;  %v898_v31 = vpop.f32.mrf.mxu0  ;;  %v911_v32 = vpop.f32.mrf.mxu1  ;;  %v940_v3 = vld [vmem:[#allocation8 + $0x4] ss:$8 sm:$0x3] }
 0x187   :  { %v971_v33 = vmul.f32 0.125, %v962_v29  ;;  %v973_v34 = vmul.f32 %v4130_v30, %v4130_v30  ;;  %v4134_v35 = vadd.f32 %v935_v28, %v923_v63  ;;  %1182 = vmatpush.bf16.msrb.mxu1 %v3232_v58  ;;  %v3268_v58 = vld [vmem:[#allocation7 + $0xcc] sm:$0xf0] }
 0x188   :  { %1169 = vmatpush.bf16.msrb.mxu0 %v3224_v19  ;;  %v2858_v19 = vld [vmem:[#allocation7 + $0xc0] sm:$0xf] }
 0x189   :  { %v975_v36 = vsub.f32 %v971_v33, %v973_v34  ;;  %v949_v26 = vrot.slane %v4134_v35, 4  ;;  %v956_v37 = vmul.f32 %v4134_v35, %v4134_v35 }
 0x18b   :  { %v950_v6 = vadd.f32 %v949_v26, %v4134_v35  ;;  %v963_v12 = vrot.slane %v956_v37, 4  ;;  %v977_v39 = vmax.f32 %v975_v36, 0.0  ;;  %v942_v26 = vld [vmem:[#allocation8 + $0x5] ss:$8 sm:$0x3] }
 0x18c   :  { %v924_v38 = vpop.f32.mrf.mxu2  ;;  %v937_v45 = vpop.f32.mrf.mxu3 }
 0x18d   :  { %v951_v40 = vrot.slane %v950_v6, 2  ;;  %v964_v41 = vadd.f32 %v963_v12, %v956_v37  ;;  %v979_v48 = vadd.f32 1e-05, %v977_v39 }
 0x18f   :  { %v952_v46 = vadd.f32 %v951_v40, %v950_v6  ;;  %v965_v47 = vrot.slane %v964_v41, 2  ;;  %3356 = vrsqrt.f32 %v979_v48  ;;  %vm987_vm5 = vweird.f32 %v979_v48 }
 0x191   :  { %v953_v49 = vrot.slane %v952_v46, 1  ;;  %v966_v50 = vadd.f32 %v965_v47, %v964_v41 }
 0x193   :  { %v954_v18 = vadd.f32 %v953_v49, %v952_v46  ;;  %v967_v5 = vrot.slane %v966_v50, 1 }
 0x195   :  { %v968_v55 = vadd.f32 %v967_v5, %v966_v50  ;;  %v970_v11 = vmul.f32 0.125, %v954_v18  ;;  %v3357_v62 = vpop.eup %3356  ;;  %v3241_v50 = vld [vmem:[%s4473_s4 + $0x4] sm:$0xf0] }
 0x196   :  { %v982_v8 = vmul.f32 %v3357_v62, %v979_v48  ;;  %vm988_vm2 = vweird.f32 %v3357_v62 }
 0x197   :  { %v972_v56 = vmul.f32 0.125, %v968_v55  ;;  %v974_v57 = vmul.f32 %v970_v11, %v970_v11  ;;  %vm989_vm6 = vmor %vm987_vm5, %vm988_vm2 }
 0x198   :  { %v983_v53 = vmul.f32 %v3357_v62, %v982_v8  ;;  %v3270_v8 = vld [vmem:[#allocation7 + $0xe4] sm:$0xf] }
 0x199   :  { %v976_v59 = vsub.f32 %v972_v56, %v974_v57  ;;  %v1189_v56 = vld [vmem:[#allocation8 + $0x7] ss:$0 sm:$0xff] }
 0x19a   :  { %v984_v16 = vmul.f32 0.5, %v983_v53  ;;  %v2879_v53 = vor.u32 %v3270_v8, %v2876_v9 }
 0x19b   :  { %v978_v0 = vmax.f32 %v976_v59, 0.0 }
 0x19c   :  { %v985_v21 = vsub.f32 1.5, %v984_v16  ;;  %v1200_v16 = vperm.slane %v1197_v61, 1  ;;  %1757 = vmatpush.bf16.msra.mxu0 %v2879_v53  ;;  %v3256_v53 = vld [vmem:[#allocation7 + $0x6c] sm:$0xf0] }
 0x19d   :  { %v980_v7 = vadd.f32 1e-05, %v978_v0  ;;  %v3272_v0 = vld [vmem:[#allocation7 + $0xec] sm:$0xf0] }
 0x19e   :  { %v986_v24 = vmul.f32 %v3357_v62, %v985_v21  ;;  %v2859_v21 = vor.u32 %v3268_v58, %v2858_v19 }
 0x19f   :  { %3358 = vrsqrt.f32 %v980_v7  ;;  %vm997_vm3 = vweird.f32 %v980_v7 }
 0x1a0   :  { %v990_v29 = vsel %vm989_vm6, %v3357_v62, %v986_v24  ;;  %v2874_v62 = vld [vmem:[#allocation7 + $0xe0] sm:$0xf]  ;;  %v2860_v24 = vld [vmem:[#allocation7 + $0xd0] sm:$0xf0] }
 0x1a1   :  { %v2875_v2 = vor.u32 %v3272_v0, %v2874_v62 }
 0x1a5   :  { %v3359_v15 = vpop.eup %3358 }
 0x1a6   :  { %v992_v17 = vmul.f32 %v3359_v15, %v980_v7  ;;  %vm998_vm1 = vweird.f32 %v3359_v15  ;;  %v3304_v7 = vld [vmem:[#allocation7 + $0x1ec] sm:$0xf0] }
 0x1a7   :  { %vm999_vm4 = vmor %vm997_vm3, %vm998_vm1  ;;  %v3003_v10 = vor.u32 %v3304_v7, %v3002_v1  ;;  %v2956_v1 = vld [vmem:[#allocation7 + $0x190] sm:$0xf0] }
 0x1a8   :  { %v993_v20 = vmul.f32 %v3359_v15, %v992_v17  ;;  %v3007_v17 = vor.u32 %v3302_v13, %v3004_v14 }
 0x1aa   :  { %v994_v22 = vmul.f32 0.5, %v993_v20  ;;  %v2986_v20 = vld [vmem:[#allocation7 + $0x1c0] sm:$0xf]  ;;  %1770 = vmatpush.bf16.msra.mxu1 %v3007_v17  ;;  %v3254_v17 = vld [vmem:[#allocation7 + $0x64] sm:$0xf] }
 0x1ac   :  { %v995_v23 = vsub.f32 1.5, %v994_v22  ;;  %v3300_v22 = vld [vmem:[#allocation7 + $0x1cc] sm:$0xf0] }
 0x1ae   :  { %v996_v25 = vmul.f32 %v3359_v15, %v995_v23  ;;  %v3266_v23 = vld [vmem:[#allocation7 + $0xc4] sm:$0xf] }
 0x1b0   :  { %v1000_v27 = vsel %vm999_vm4, %v3359_v15, %v996_v25  ;;  %v1199_v15 = vperm.slane %v1197_v61, 0  ;;  %v2987_v25 = vor.u32 %v3300_v22, %v2986_v20  ;;  %v2812_v22 = vld [vmem:[#allocation7 + $0x70] sm:$0xf0] }
 0x1b1   :  { %v1003_v28 = vrot.slane %v1000_v27, 7  ;;  %v2863_v27 = vor.u32 %v3266_v23, %v2860_v24  ;;  %v3286_v23 = vld [vmem:[#allocation7 + $0x164] sm:$0xf] }
 0x1b3   :  { %v1004_v63 = vsel %vm386_vm9, %v990_v29, %v1003_v28  ;;  %v2988_v28 = vld [vmem:[#allocation7 + $0x1d0] sm:$0xf0]  ;;  %1758 = vmatpush.bf16.msra.mxu0 %v2863_v27 }
 0x1b4   :  { %v1006_v31 = vmul.f32 %v1004_v63, %v940_v3  ;;  %v3298_v3 = vld [vmem:[#allocation7 + $0x1c4] sm:$0xf]  ;;  %v2940_v27 = vld [vmem:[#allocation7 + $0x170] sm:$0xf0] }
 0x1b6   :  { %v1009_v32 = vperm.slane %v1006_v31, 1  ;;  %v1008_v33 = vperm.slane %v1006_v31, 0  ;;  %v2991_v31 = vor.u32 %v3298_v3, %v2988_v28 }
 0x1b8   :  { %v1013_v34 = vmul.f32 %v1009_v32, %v970_v11  ;;  %v1012_v37 = vmul.f32 %v1008_v33, %v4130_v30  ;;  %v1021_v38 = vmul.f32 %v1009_v32, %v4134_v35  ;;  %v1020_v45 = vmul.f32 %v1008_v33, %v4124_v4  ;;  %v3240_v30 = vld [vmem:[%s4473_s4 + $0x4] sm:$0xf]  ;;  %v2754_v35 = vld [vmem:[%s4473_s4 + $0x8] sm:$0xf0]  ;;  %v2752_v4 = vld [vmem:[%s4473_s4] sm:$0xf]  ;;  %1771 = vmatpush.bf16.msra.mxu1 %v2991_v31 }
 0x1b9   :  { %v2757_v49 = vor.u32 %v3240_v30, %v2754_v35  ;;  %v2753_v52 = vor.u32 %v3241_v50, %v2752_v4  ;;  %v2826_v50 = vld [vmem:[#allocation7 + $0x80] sm:$0xf] }
 0x1ba   :  { %v1016_v36 = vrot.slane %v1013_v34, 7  ;;  %v2842_v34 = vld [vmem:[#allocation7 + $0xa0] sm:$0xf] }
 0x1bb   :  { %1236 = vmatpush.bf16.msrb.mxu3 %v2757_v49  ;;  %1223 = vmatpush.bf16.msrb.mxu2 %v2753_v52  ;;  %v3260_v52 = vld [vmem:[#allocation7 + $0x8c] sm:$0xf0]  ;;  %v2794_v31 = vld [vmem:[#allocation7 + $0x40] sm:$0xf] }
 0x1bc   :  { %v1017_v6 = vsel %vm386_vm9, %v1012_v37, %v1016_v36  ;;  %v3264_v36 = vld [vmem:[#allocation7 + $0xac] sm:$0xf0] }
 0x1bd   :  { %v1019_v12 = vsub.f32 %v942_v26, %v1017_v6  ;;  %v2970_v26 = vld [vmem:[#allocation7 + $0x1a0] sm:$0xf]  ;;  %v2843_v37 = vor.u32 %v3264_v36, %v2842_v34  ;;  %v3296_v6 = vld [vmem:[#allocation7 + $0x1ac] sm:$0xf0]  ;;  %v2943_v36 = vor.u32 %v3286_v23, %v2940_v27  ;;  %v3305_v23 = vld [vmem:[#allocation7 + $0x1f4] sm:$0xf0] }
 0x1be   :  { %v3252_v34 = vld [vmem:[#allocation7 + $0x4c] sm:$0xf0]  ;;  %v3271_v27 = vld [vmem:[#allocation7 + $0xec] sm:$0xf] }
 0x1bf   :  { %v1023_v39 = vperm.slane %v1019_v12, 0  ;;  %v1024_v40 = vperm.slane %v1019_v12, 1  ;;  %1731 = vmatpush.bf16.msra.mxu2 %v2875_v2  ;;  %1744 = vmatpush.bf16.msra.mxu3 %v3003_v10  ;;  %v3262_v12 = vld [vmem:[#allocation7 + $0xa4] sm:$0xf]  ;;  %v2810_v10 = vld [vmem:[#allocation7 + $0x60] sm:$0xf] }
 0x1c0   :  { %v2811_v14 = vor.u32 %v3256_v53, %v2810_v10  ;;  %v3242_v10 = vld [vmem:[#allocation7 + $0x4] sm:$0xf] }
 0x1c1   :  { %v1027_v41 = vadd.f32 %v1023_v39, %v1020_v45  ;;  %v1028_v42 = vadd.f32 %v1024_v40, %v1021_v38  ;;  %v2844_v38 = vld [vmem:[#allocation7 + $0xb0] sm:$0xf0] }
 0x1c3   :  { %v1029_v44 = vmax.f32 %v1027_v41, 0.0  ;;  %v1030_v46 = vmax.f32 %v1028_v42, 0.0  ;;  %1732 = vmatpush.bf16.msra.mxu2 %v2859_v21  ;;  %1745 = vmatpush.bf16.msra.mxu3 %v2987_v25  ;;  %v3294_v42 = vld [vmem:[#allocation7 + $0x1a4] sm:$0xf]  ;;  %v2815_v25 = vor.u32 %v3254_v17, %v2812_v22  ;;  %v3010_v22 = vld [vmem:[#allocation7 + $0x1e8] sm:$0xf] }
 0x1c4   :  { %v3274_v17 = vld [vmem:[#allocation7 + $0x104] sm:$0xf] }
 0x1c5   :  { %v1031_v47 = vpack.c.bf16 %v1029_v44, %v1029_v44  ;;  %v1032_v48 = vpack.c.bf16 %v1030_v46, %v1030_v46  ;;  %v2972_v44 = vld [vmem:[#allocation7 + $0x1b0] sm:$0xf0]  ;;  %v2971_v46 = vor.u32 %v3296_v6, %v2970_v26  ;;  %v2795_v26 = vor.u32 %v3252_v34, %v2794_v31  ;;  %v3284_v6 = vld [vmem:[#allocation7 + $0x14c] sm:$0xf0]  ;;  %v2866_v31 = vld [vmem:[#allocation7 + $0xc8] sm:$0xf] }
 0x1c6   :  { %v3269_v34 = vld [vmem:[#allocation7 + $0xd4] sm:$0xf0] }
 0x1c7   :  { %1170 = vmatmul.bf16.vlgmr.msrb.gmra.mxu0 %v1031_v47  ;;  %1183 = vmatmul.bf16.vlgmr.msrb.gmra.mxu1 %v1032_v48  ;;  %v2847_v47 = vor.u32 %v3262_v12, %v2844_v38  ;;  %v2975_v48 = vor.u32 %v3294_v42, %v2972_v44  ;;  %v3250_v12 = vld [vmem:[#allocation7 + $0x44] sm:$0xf] }
 0x1c8   :  { %1733 = vmatpush.bf16.msra.mxu2 %v2843_v37  ;;  %1746 = vmatpush.bf16.msra.mxu3 %v2971_v46  ;;  %v2922_v37 = vld [vmem:[#allocation7 + $0x140] sm:$0xf]  ;;  %v3282_v42 = vld [vmem:[#allocation7 + $0x144] sm:$0xf] }
 0x1c9   :  { %1759 = vmatpush.bf16.msra.mxu0 %v2847_v47  ;;  %1772 = vmatpush.bf16.msra.mxu1 %v2975_v48  ;;  %v2923_v44 = vor.u32 %v3284_v6, %v2922_v37  ;;  %v2924_v47 = vld [vmem:[#allocation7 + $0x150] sm:$0xf0]  ;;  %v2994_v37 = vld [vmem:[#allocation7 + $0x1c8] sm:$0xf]  ;;  %v3301_v6 = vld [vmem:[#allocation7 + $0x1d4] sm:$0xf0] }
 0x244   :  { %v1171_v18 = vpop.f32.mrf.mxu0  ;;  %v1184_v5 = vpop.f32.mrf.mxu1 }
 0x245   :  { %v1172_v55 = vadd.f32 %v1171_v18, %v1065_v54  ;;  %v2827_v54 = vor.u32 %v3260_v52, %v2826_v50  ;;  %v2954_v18 = vld [vmem:[#allocation7 + $0x180] sm:$0xf]  ;;  %v3248_v50 = vld [vmem:[#allocation7 + $0x2c] sm:$0xf0]  ;;  %v2927_v52 = vor.u32 %v3282_v42, %v2924_v47  ;;  %v2996_v42 = vld [vmem:[#allocation7 + $0x1d8] sm:$0xf0] }
 0x246   :  { %v2850_v47 = vld [vmem:[#allocation7 + $0xa8] sm:$0xf] }
 0x247   :  { %v1185_v11 = vadd.f32 %v1184_v5, %v1172_v55  ;;  %v3292_v5 = vld [vmem:[#allocation7 + $0x18c] sm:$0xf0]  ;;  %v3258_v55 = vld [vmem:[#allocation7 + $0x84] sm:$0xf]  ;;  %1734 = vmatpush.bf16.msra.mxu2 %v2827_v54 }
 0x248   :  { %v2955_v62 = vor.u32 %v3292_v5, %v2954_v18  ;;  %v2906_v18 = vld [vmem:[#allocation7 + $0x120] sm:$0xf]  ;;  %v3280_v5 = vld [vmem:[#allocation7 + $0x12c] sm:$0xf0] }
 0x249   :  { %3360 = vtanh.f32 %v1185_v11 }
 0x24a   :  { %1747 = vmatpush.bf16.msra.mxu3 %v2955_v62 }
 0x24b   :  { %1735 = vmatpush.bf16.msra.mxu2 %v2811_v14 }
 0x24c   :  { %v1173_v43 = vpop.f32.mrf.mxu0  ;;  %v1186_v51 = vpop.f32.mrf.mxu1 }
 0x24f   :  { %v3361_v57 = vpop.eup %3360  ;;  %1736 = vmatpush.bf16.msra.mxu2 %v2795_v26  ;;  %v2867_v26 = vor.u32 %v3269_v34, %v2866_v31 }
 0x250   :  { %v1190_v59 = vadd.f32 %v3361_v57, %v1189_v56  ;;  %v2828_v57 = vld [vmem:[#allocation7 + $0x90] sm:$0xf0] }
 0x251   :  { %v2831_v0 = vor.u32 %v3258_v55, %v2828_v57  ;;  %v3246_v55 = vld [vmem:[#allocation7 + $0x24] sm:$0xf] }
 0x252   :  { %v1193_v60 = vpack.c.bf16 %v1190_v59, %v1190_v59  ;;  %1192 = vst.msk [vmem:[#allocation11] sm:$0xff] %vm1191_vm7, %v1190_v59  ;;  %v3290_v59 = vld [vmem:[#allocation7 + $0x184] sm:$0xf] }
 0x253   :  { %1760 = vmatpush.bf16.msra.mxu0 %v2831_v0  ;;  %v2959_v13 = vor.u32 %v3290_v59, %v2956_v1  ;;  %v3278_v57 = vld [vmem:[#allocation7 + $0x124] sm:$0xf]  ;;  %v2908_v59 = vld [vmem:[#allocation7 + $0x130] sm:$0xf0]  ;;  %v2762_v1 = vld [vmem:[#allocation7] sm:$0xf] }
 0x254   :  { %2758 = vmatmul.msk.bf16.vlgmr.msrb.gmra.mxu2 %vm1191_vm7, %v1193_v60  ;;  %2759 = vmatmul.msk.bf16.vlgmr.msrb.gmra.mxu3 %vm1191_vm7, %v1193_v60 }
 0x255   :  { %1773 = vmatpush.bf16.msra.mxu1 %v2959_v13 }
 0x257   :  { %1761 = vmatpush.bf16.msra.mxu0 %v2815_v25  ;;  %v3011_v25 = vor.u32 %v3305_v23, %v3010_v22  ;;  %v3289_v22 = vld [vmem:[#allocation7 + $0x174] sm:$0xf0]  ;;  %v3255_v23 = vld [vmem:[#allocation7 + $0x6c] sm:$0xf] }
 0x259   :  { %1774 = vmatpush.bf16.msra.mxu1 %v2943_v36 }
 0x25d   :  { %1775 = vmatpush.bf16.msra.mxu1 %v2927_v52 }
 0x2d7   :  { %v1225_v29 = vpop.f32.mrf.mxu2  ;;  %v1238_v63 = vpop.f32.mrf.mxu3 }
 0x2d8   :  { %v4205_v32 = vadd.f32 %v1225_v29, %v1199_v15  ;;  %v4207_v33 = vadd.f32 %v1238_v63, %v1200_v16  ;;  %v2938_v15 = vld [vmem:[#allocation7 + $0x160] sm:$0xf]  ;;  %v3288_v16 = vld [vmem:[#allocation7 + $0x16c] sm:$0xf0] }
 0x2d9   :  { %v2939_v24 = vor.u32 %v3288_v16, %v2938_v15  ;;  %v2764_v15 = vld [vmem:[#allocation7 + $0x10] sm:$0xf0] }
 0x2da   :  { %v1246_v45 = vrot.slane %v4205_v32, 4  ;;  %v1258_v39 = vmul.f32 %v4205_v32, %v4205_v32  ;;  %v1252_v40 = vrot.slane %v4207_v33, 4  ;;  %v1259_v41 = vmul.f32 %v4207_v33, %v4207_v33 }
 0x2db   :  { %1748 = vmatpush.bf16.msra.mxu3 %v2939_v24  ;;  %v2767_v16 = vor.u32 %v3242_v10, %v2764_v15 }
 0x2dc   :  { %v1247_v30 = vadd.f32 %v1246_v45, %v4205_v32  ;;  %v1260_v35 = vrot.slane %v1258_v39, 4  ;;  %v1253_v4 = vadd.f32 %v1252_v40, %v4207_v33  ;;  %v1266_v49 = vrot.slane %v1259_v41, 4 }
 0x2de   :  { %v1248_v11 = vrot.slane %v1247_v30, 2  ;;  %v1261_v43 = vadd.f32 %v1260_v35, %v1258_v39  ;;  %v1254_v51 = vrot.slane %v1253_v4, 2  ;;  %v1267_v56 = vadd.f32 %v1266_v49, %v1259_v41  ;;  %v2796_v41 = vld [vmem:[#allocation7 + $0x50] sm:$0xf0]  ;;  %v2778_v49 = vld [vmem:[#allocation7 + $0x20] sm:$0xf] }
 0x2df   :  { %v1227_v60 = vpop.f32.mrf.mxu2  ;;  %v1240_v61 = vpop.f32.mrf.mxu3  ;;  %v2799_v46 = vor.u32 %v3250_v12, %v2796_v41  ;;  %1749 = vmatpush.bf16.msra.mxu3 %v2923_v44  ;;  %v2779_v54 = vor.u32 %v3248_v50, %v2778_v49  ;;  %v3267_v12 = vld [vmem:[#allocation7 + $0xcc] sm:$0xf]  ;;  %v2852_v50 = vld [vmem:[#allocation7 + $0xb8] sm:$0xf0] }
 0x2e0   :  { %v1249_v2 = vadd.f32 %v1248_v11, %v1247_v30  ;;  %v1262_v7 = vrot.slane %v1261_v43, 2  ;;  %v1255_v8 = vadd.f32 %v1254_v51, %v1253_v4  ;;  %v1268_v9 = vrot.slane %v1267_v56, 2  ;;  %v3299_v41 = vld [vmem:[#allocation7 + $0x1cc] sm:$0xf] }
 0x2e1   :  { %1762 = vmatpush.bf16.msra.mxu0 %v2799_v46  ;;  %v2907_v51 = vor.u32 %v3280_v5, %v2906_v18  ;;  %1737 = vmatpush.bf16.msra.mxu2 %v2779_v54  ;;  %v2911_v61 = vor.u32 %v3278_v57, %v2908_v59  ;;  %v2999_v46 = vor.u32 %v3299_v41, %v2996_v42  ;;  %v3263_v49 = vld [vmem:[#allocation7 + $0xac] sm:$0xf]  ;;  %v3261_v57 = vld [vmem:[#allocation7 + $0x94] sm:$0xf0] }
 0x2e2   :  { %v1250_v19 = vrot.slane %v1249_v2, 1  ;;  %v1263_v58 = vadd.f32 %v1262_v7, %v1261_v43  ;;  %v1256_v20 = vrot.slane %v1255_v8, 1  ;;  %v1269_v21 = vadd.f32 %v1268_v9, %v1267_v56  ;;  %v2780_v56 = vld [vmem:[#allocation7 + $0x30] sm:$0xf0]  ;;  %v3276_v9 = vld [vmem:[#allocation7 + $0x10c] sm:$0xf0] }
 0x2e3   :  { %v2783_v60 = vor.u32 %v3246_v55, %v2780_v56  ;;  %1750 = vmatpush.bf16.msra.mxu3 %v2907_v51  ;;  %1776 = vmatpush.bf16.msra.mxu1 %v2911_v61  ;;  %v3295_v5 = vld [vmem:[#allocation7 + $0x1ac] sm:$0xf]  ;;  %v2980_v55 = vld [vmem:[#allocation7 + $0x1b8] sm:$0xf0]  ;;  %v2855_v51 = vor.u32 %v3263_v49, %v2852_v50  ;;  %v2834_v56 = vld [vmem:[#allocation7 + $0x88] sm:$0xf] }
 0x2e4   :  { %v1251_v3 = vadd.f32 %v1250_v19, %v1249_v2  ;;  %v1264_v28 = vrot.slane %v1263_v58, 1  ;;  %v1257_v29 = vadd.f32 %v1256_v20, %v1255_v8  ;;  %v1270_v63 = vrot.slane %v1269_v21, 1  ;;  %v3244_v2 = vld [vmem:[#allocation7 + $0xc] sm:$0xf0]  ;;  %v2890_v8 = vld [vmem:[#allocation7 + $0x100] sm:$0xf] }
 0x2e5   :  { %1763 = vmatpush.bf16.msra.mxu0 %v2783_v60  ;;  %v2763_v7 = vor.u32 %v3244_v2, %v2762_v1  ;;  %v2891_v14 = vor.u32 %v3276_v9, %v2890_v8  ;;  %v2892_v19 = vld [vmem:[#allocation7 + $0x110] sm:$0xf0]  ;;  %v2983_v60 = vor.u32 %v3295_v5, %v2980_v55  ;;  %v2962_v61 = vld [vmem:[#allocation7 + $0x188] sm:$0xf]  ;;  %v2836_v2 = vld [vmem:[#allocation7 + $0x98] sm:$0xf0]  ;;  %v2835_v10 = vor.u32 %v3261_v57, %v2834_v56 }
 0x2e6   :  { %v1265_v38 = vadd.f32 %v1264_v28, %v1263_v58  ;;  %v4217_v45 = vmul.f32 0.125, %v1251_v3  ;;  %v1271_v39 = vadd.f32 %v1270_v63, %v1269_v21  ;;  %v4219_v40 = vmul.f32 0.125, %v1257_v29  ;;  %v2882_v58 = vld [vmem:[#allocation7 + $0xe8] sm:$0xf]  ;;  %v3273_v21 = vld [vmem:[#allocation7 + $0xf4] sm:$0xf0] }
 0x2e7   :  { %1738 = vmatpush.bf16.msra.mxu2 %v2763_v7  ;;  %v2895_v20 = vor.u32 %v3274_v17, %v2892_v19  ;;  %1751 = vmatpush.bf16.msra.mxu3 %v2891_v14  ;;  %v2883_v24 = vor.u32 %v3273_v21, %v2882_v58  ;;  %v2884_v3 = vld [vmem:[#allocation7 + $0xf8] sm:$0xf0]  ;;  %v3303_v28 = vld [vmem:[#allocation7 + $0x1ec] sm:$0xf]  ;;  %v2818_v14 = vld [vmem:[#allocation7 + $0x68] sm:$0xf] }
 0x2e8   :  { %v1274_v48 = vmul.f32 0.125, %v1265_v38  ;;  %v1276_v30 = vmul.f32 %v4217_v45, %v4217_v45  ;;  %v1275_v35 = vmul.f32 0.125, %v1271_v39  ;;  %v1277_v4 = vmul.f32 %v4219_v40, %v4219_v40  ;;  %v3012_v63 = vld [vmem:[#allocation7 + $0x1f8] sm:$0xf0]  ;;  %v3291_v7 = vld [vmem:[#allocation7 + $0x18c] sm:$0xf] }
 0x2e9   :  { %1764 = vmatpush.bf16.msra.mxu0 %v2767_v16  ;;  %v2887_v29 = vor.u32 %v3271_v27, %v2884_v3  ;;  %1777 = vmatpush.bf16.msra.mxu1 %v2895_v20  ;;  %v3015_v36 = vor.u32 %v3303_v28, %v3012_v63  ;;  %v2995_v38 = vor.u32 %v3301_v6, %v2994_v37  ;;  %v2868_v39 = vld [vmem:[#allocation7 + $0xd8] sm:$0xf0]  ;;  %v3257_v19 = vld [vmem:[#allocation7 + $0x74] sm:$0xf0]  ;;  %v2946_v58 = vld [vmem:[#allocation7 + $0x168] sm:$0xf] }
 0x2ea   :  { %v1278_v11 = vsub.f32 %v1274_v48, %v1276_v30  ;;  %v1279_v43 = vsub.f32 %v1275_v35, %v1277_v4  ;;  %v2871_v44 = vor.u32 %v3267_v12, %v2868_v39  ;;  %v3265_v48 = vld [vmem:[#allocation7 + $0xb4] sm:$0xf0]  ;;  %v2978_v30 = vld [vmem:[#allocation7 + $0x1a8] sm:$0xf]  ;;  %v2964_v8 = vld [vmem:[#allocation7 + $0x198] sm:$0xf0]  ;;  %v2819_v28 = vor.u32 %v3257_v19, %v2818_v14 }
 0x2eb   :  { %1783 = vmatpush.bf16.msrb.mxu2 %v2883_v24  ;;  %1796 = vmatpush.bf16.msrb.mxu3 %v3011_v25  ;;  %v3297_v4 = vld [vmem:[#allocation7 + $0x1b4] sm:$0xf0]  ;;  %v2851_v18 = vor.u32 %v3265_v48, %v2850_v47  ;;  %v2967_v21 = vor.u32 %v3291_v7, %v2964_v8  ;;  %v2820_v25 = vld [vmem:[#allocation7 + $0x78] sm:$0xf0]  ;;  %v3287_v27 = vld [vmem:[#allocation7 + $0x16c] sm:$0xf] }
 0x2ec   :  { %v1280_v62 = vmax.f32 %v1278_v11, 0.0  ;;  %v1281_v0 = vmax.f32 %v1279_v43, 0.0  ;;  %v2979_v43 = vor.u32 %v3297_v4, %v2978_v30  ;;  %v2948_v63 = vld [vmem:[#allocation7 + $0x178] sm:$0xf0]  ;;  %v2930_v37 = vld [vmem:[#allocation7 + $0x148] sm:$0xf] }
 0x2ed   :  { %1809 = vmatpush.bf16.msrb.mxu0 %v2887_v29  ;;  %1822 = vmatpush.bf16.msrb.mxu1 %v3015_v36  ;;  %v2947_v29 = vor.u32 %v3289_v22, %v2946_v58  ;;  %v2802_v36 = vld [vmem:[#allocation7 + $0x48] sm:$0xf]  ;;  %v2951_v6 = vor.u32 %v3287_v27, %v2948_v63  ;;  %v3285_v12 = vld [vmem:[#allocation7 + $0x154] sm:$0xf0]  ;;  %v2804_v39 = vld [vmem:[#allocation7 + $0x58] sm:$0xf0] }
 0x2ee   :  { %v4225_v53 = vadd.f32 1e-05, %v1280_v62  ;;  %v4227_v13 = vadd.f32 1e-05, %v1281_v0  ;;  %v3293_v62 = vld [vmem:[#allocation7 + $0x194] sm:$0xf0]  ;;  %v2931_v4 = vor.u32 %v3285_v12, %v2930_v37 }
 0x2ef   :  { %1784 = vmatpush.bf16.msrb.mxu2 %v2867_v26  ;;  %1797 = vmatpush.bf16.msrb.mxu3 %v2995_v38  ;;  %v3259_v0 = vld [vmem:[#allocation7 + $0x8c] sm:$0xf]  ;;  %v2963_v16 = vor.u32 %v3293_v62, %v2962_v61  ;;  %v3253_v26 = vld [vmem:[#allocation7 + $0x54] sm:$0xf0]  ;;  %v2916_v56 = vld [vmem:[#allocation7 + $0x138] sm:$0xf0] }
 0x2f0   :  { %3362 = vrsqrt.f32 %v4225_v53  ;;  %v2839_v17 = vor.u32 %v3259_v0, %v2836_v2  ;;  %vm1300_vm10 = vweird.f32 %v4227_v13  ;;  %v3251_v38 = vld [vmem:[#allocation7 + $0x4c] sm:$0xf]  ;;  %vm1290_vm15 = vweird.f32 %v4225_v53  ;;  %v3249_v50 = vld [vmem:[#allocation7 + $0x34] sm:$0xf0] }
 0x2f1   :  { %3364 = vrsqrt.f32 %v4227_v13  ;;  %1810 = vmatpush.bf16.msrb.mxu0 %v2871_v44  ;;  %1823 = vmatpush.bf16.msrb.mxu1 %v2999_v46  ;;  %v3283_v42 = vld [vmem:[#allocation7 + $0x14c] sm:$0xf]  ;;  %v2932_v44 = vld [vmem:[#allocation7 + $0x158] sm:$0xf0]  ;;  %v2803_v48 = vor.u32 %v3253_v26, %v2802_v36  ;;  %v2807_v49 = vor.u32 %v3251_v38, %v2804_v39  ;;  %v3281_v5 = vld [vmem:[#allocation7 + $0x134] sm:$0xf0] }
 0x2f2   :  { %v1243_v46 = vld [vmem:[#allocation8 + $0x21] ss:$8 sm:$0x3]  ;;  %v3247_v55 = vld [vmem:[#allocation7 + $0x2c] sm:$0xf] }
 0x2f3   :  { %1785 = vmatpush.bf16.msrb.mxu2 %v2851_v18  ;;  %1798 = vmatpush.bf16.msrb.mxu3 %v2979_v43  ;;  %v2935_v18 = vor.u32 %v3283_v42, %v2932_v44  ;;  %v3245_v0 = vld [vmem:[#allocation7 + $0x14] sm:$0xf0]  ;;  %v3243_v8 = vld [vmem:[#allocation7 + $0xc] sm:$0xf] }
 0x2f4   :  { %v3277_v7 = vld [vmem:[#allocation7 + $0x114] sm:$0xf0]  ;;  %v3275_v14 = vld [vmem:[#allocation7 + $0x10c] sm:$0xf] }
 0x2f5   :  { %1811 = vmatpush.bf16.msrb.mxu0 %v2855_v51  ;;  %1824 = vmatpush.bf16.msrb.mxu1 %v2983_v60  ;;  %v3279_v51 = vld [vmem:[#allocation7 + $0x12c] sm:$0xf]  ;;  %v1245_v19 = vld [vmem:[#allocation8 + $0x22] ss:$8 sm:$0x3] }
 0x2f6   :  { %v4231_v35 = vpop.eup %3362  ;;  %v2919_v2 = vor.u32 %v3279_v51, %v2916_v56 }
 0x2f7   :  { %v4233_v52 = vpop.eup %3364  ;;  %v1285_v54 = vmul.f32 %v4231_v35, %v4225_v53  ;;  %1786 = vmatpush.bf16.msrb.mxu2 %v2835_v10  ;;  %vm1291_vm14 = vweird.f32 %v4231_v35  ;;  %1799 = vmatpush.bf16.msrb.mxu3 %v2963_v16  ;;  %v2786_v53 = vld [vmem:[#allocation7 + $0x28] sm:$0xf] }
 0x2f8   :  { %v1295_v11 = vmul.f32 %v4233_v52, %v4227_v13  ;;  %vm1301_vm8 = vweird.f32 %v4233_v52  ;;  %v2823_v13 = vor.u32 %v3255_v23, %v2820_v25  ;;  %vm1292_vm1 = vmor %vm1290_vm15, %vm1291_vm14  ;;  %v2787_v57 = vor.u32 %v3249_v50, %v2786_v53 }
 0x2f9   :  { %v1286_v59 = vmul.f32 %v4231_v35, %v1285_v54  ;;  %vm4245_vm13 = vmor %vm1300_vm10, %vm1301_vm8  ;;  %1812 = vmatpush.bf16.msrb.mxu0 %v2839_v17  ;;  %1825 = vmatpush.bf16.msrb.mxu1 %v2967_v21  ;;  %v2914_v54 = vld [vmem:[#allocation7 + $0x128] sm:$0xf] }
 0x2fa   :  { %v1296_v1 = vmul.f32 %v4233_v52, %v1295_v11  ;;  %v2788_v11 = vld [vmem:[#allocation7 + $0x38] sm:$0xf0]  ;;  %v2915_v61 = vor.u32 %v3281_v5, %v2914_v54 }
 0x2fb   :  { %v1287_v9 = vmul.f32 0.5, %v1286_v59  ;;  %1787 = vmatpush.bf16.msrb.mxu2 %v2819_v28  ;;  %1800 = vmatpush.bf16.msrb.mxu3 %v2947_v29  ;;  %v2791_v62 = vor.u32 %v3247_v55, %v2788_v11 }
 0x2fc   :  { %v1297_v15 = vmul.f32 0.5, %v1296_v1  ;;  %v2898_v1 = vld [vmem:[#allocation7 + $0x108] sm:$0xf] }
 0x2fd   :  { %v1288_v20 = vsub.f32 1.5, %v1287_v9  ;;  %1813 = vmatpush.bf16.msrb.mxu0 %v2823_v13  ;;  %1826 = vmatpush.bf16.msrb.mxu1 %v2951_v6  ;;  %v2772_v9 = vld [vmem:[#allocation7 + $0x18] sm:$0xf0] }
 0x2fe   :  { %v1298_v24 = vsub.f32 1.5, %v1297_v15  ;;  %v2900_v15 = vld [vmem:[#allocation7 + $0x118] sm:$0xf0]  ;;  %v2775_v21 = vor.u32 %v3243_v8, %v2772_v9 }
 0x2ff   :  { %v1289_v31 = vmul.f32 %v4231_v35, %v1288_v20  ;;  %1788 = vmatpush.bf16.msrb.mxu2 %v2803_v48  ;;  %1801 = vmatpush.bf16.msrb.mxu3 %v2931_v4  ;;  %v2899_v20 = vor.u32 %v3277_v7, %v2898_v1  ;;  %v2903_v22 = vor.u32 %v3275_v14, %v2900_v15 }
 0x300   :  { %v1299_v34 = vmul.f32 %v4233_v52, %v1298_v24 }
 0x301   :  { %v1293_v30 = vsel %vm1292_vm1, %v4231_v35, %v1289_v31  ;;  %v2770_v35 = vld [vmem:[#allocation7 + $0x8] sm:$0xf]  ;;  %1814 = vmatpush.bf16.msrb.mxu0 %v2807_v49  ;;  %1827 = vmatpush.bf16.msrb.mxu1 %v2935_v18 }
 0x302   :  { %v1303_v41 = vsel %vm4245_vm13, %v4233_v52, %v1299_v34  ;;  %v2771_v16 = vor.u32 %v3245_v0, %v2770_v35 }
 0x303   :  { %v1306_v47 = vrot.slane %v1303_v41, 7  ;;  %1789 = vmatpush.bf16.msrb.mxu2 %v2787_v57  ;;  %1802 = vmatpush.bf16.msrb.mxu3 %v2915_v61 }
 0x305   :  { %v1307_v52 = vsel %vm386_vm9, %v1293_v30, %v1306_v47  ;;  %1815 = vmatpush.bf16.msrb.mxu0 %v2791_v62  ;;  %1828 = vmatpush.bf16.msrb.mxu1 %v2919_v2 }
 0x306   :  { %v1309_v43 = vmul.f32 %v1307_v52, %v1243_v46 }
 0x307   :  { %1790 = vmatpush.bf16.msrb.mxu2 %v2771_v16  ;;  %1803 = vmatpush.bf16.msrb.mxu3 %v2899_v20 }
 0x308   :  { %v1312_v59 = vperm.slane %v1309_v43, 1  ;;  %v1311_v60 = vperm.slane %v1309_v43, 0 }
 0x309   :  { %1816 = vmatpush.bf16.msrb.mxu0 %v2775_v21  ;;  %1829 = vmatpush.bf16.msrb.mxu1 %v2903_v22 }
 0x30a   :  { %v1316_v10 = vmul.f32 %v1312_v59, %v4219_v40  ;;  %v1315_v58 = vmul.f32 %v1311_v60, %v4217_v45  ;;  %v1324_v40 = vmul.f32 %v1312_v59, %v4207_v33  ;;  %v1323_v25 = vmul.f32 %v1311_v60, %v4205_v32  ;;  %v1401_v33 = vld [vmem:[#allocation8 + $0x23] ss:$8 sm:$0xf] }
 0x30b   :  { %v1404_v13 = vperm.slane %v1401_v33, 1  ;;  %v1403_v37 = vperm.slane %v1401_v33, 0  ;;  %v1406_v56 = vperm.slane %v1401_v33, 3  ;;  %v1405_v14 = vperm.slane %v1401_v33, 2 }
 0x30c   :  { %v1319_v17 = vrot.slane %v1316_v10, 7 }
 0x30e   :  { %v1320_v23 = vsel %vm386_vm9, %v1315_v58, %v1319_v17 }
 0x30f   :  { %v1322_v24 = vsub.f32 %v1245_v19, %v1320_v23 }
 0x311   :  { %v1326_v27 = vperm.slane %v1322_v24, 0  ;;  %v1327_v3 = vperm.slane %v1322_v24, 1 }
 0x313   :  { %v1330_v45 = vadd.f32 %v1326_v27, %v1323_v25  ;;  %v1331_v28 = vadd.f32 %v1327_v3, %v1324_v40 }
 0x315   :  { %v1332_v29 = vmax.f32 %v1330_v45, 0.0  ;;  %v1333_v63 = vmax.f32 %v1331_v28, 0.0 }
 0x317   :  { %v1334_v31 = vpack.c.bf16 %v1332_v29, %v1332_v29  ;;  %v1335_v34 = vpack.c.bf16 %v1333_v63, %v1333_v63 }
 0x319   :  { %1739 = vmatmul.bf16.vlgmr.msra.gmra.mxu2 %v1334_v31  ;;  %1752 = vmatmul.bf16.vlgmr.msra.gmra.mxu3 %v1335_v34 }
 0x31a   :  { %1765 = vmatmul.bf16.vlgmr.msra.gmra.mxu0 %v1334_v31  ;;  %1778 = vmatmul.bf16.vlgmr.msra.gmra.mxu1 %v1335_v34 }
 0x329   :  { %1791 = vmatmul.bf16.vlgmr.msrb.gmra.mxu2 %v1334_v31  ;;  %1804 = vmatmul.bf16.vlgmr.msrb.gmra.mxu3 %v1335_v34 }
 0x32a   :  { %1817 = vmatmul.bf16.vlgmr.msrb.gmra.mxu0 %v1334_v31  ;;  %1830 = vmatmul.bf16.vlgmr.msrb.gmra.mxu1 %v1335_v34 }
 0x397   :  { %v1766_v32 = vpop.f32.mrf.mxu0  ;;  %v1779_v36 = vpop.f32.mrf.mxu1 }
 0x398   :  { %v1767_v26 = vadd.f32 %v1766_v32, %v1404_v13 }
 0x39a   :  { %v4265_v6 = vadd.f32 %v1779_v36, %v1767_v26 }
 0x39c   :  { %v1845_v12 = vrot.slane %v4265_v6, 4  ;;  %v1864_v38 = vmul.f32 %v4265_v6, %v4265_v6  ;;  %v1740_v39 = vpop.f32.mrf.mxu2  ;;  %v1753_v41 = vpop.f32.mrf.mxu3 }
 0x39d   :  { %v1741_v42 = vadd.f32 %v1740_v39, %v1403_v37 }
 0x39e   :  { %v1846_v44 = vadd.f32 %v1845_v12, %v4265_v6  ;;  %v1873_v46 = vrot.slane %v1864_v38, 4 }
 0x39f   :  { %v4271_v47 = vadd.f32 %v1753_v41, %v1741_v42  ;;  %v1768_v48 = vpop.f32.mrf.mxu0  ;;  %v1781_v30 = vpop.f32.mrf.mxu1 }
 0x3a0   :  { %v1847_v4 = vrot.slane %v1846_v44, 2  ;;  %v1874_v49 = vadd.f32 %v1873_v46, %v1864_v38 }
 0x3a1   :  { %v1839_v53 = vrot.slane %v4271_v47, 4  ;;  %v1863_v50 = vmul.f32 %v4271_v47, %v4271_v47 }
 0x3a2   :  { %v1848_v54 = vadd.f32 %v1847_v4, %v1846_v44  ;;  %v1875_v52 = vrot.slane %v1874_v49, 2 }
 0x3a3   :  { %v1840_v18 = vadd.f32 %v1839_v53, %v4271_v47  ;;  %v1867_v5 = vrot.slane %v1863_v50, 4 }
 0x3a4   :  { %v1849_v55 = vrot.slane %v1848_v54, 1  ;;  %v1876_v11 = vadd.f32 %v1875_v52, %v1874_v49  ;;  %v1742_v43 = vpop.f32.mrf.mxu2  ;;  %v1755_v51 = vpop.f32.mrf.mxu3  ;;  %v3313_v52 = vld [vmem:[%s4475_s6 + $0x38] sm:$0xff] }
 0x3a5   :  { %v1841_v57 = vrot.slane %v1840_v18, 2  ;;  %v1868_v35 = vadd.f32 %v1867_v5, %v1863_v50  ;;  %v3329_v5 = vld [vmem:[%s4475_s6 + $0xb8] sm:$0xff]  ;;  %2274 = vmatpush.bf16.msra.mxu2 %v3313_v52  ;;  %v3315_v52 = vld [vmem:[%s4475_s6 + $0x48] sm:$0xff] }
 0x3a6   :  { %v1850_v59 = vadd.f32 %v1849_v55, %v1848_v54  ;;  %v1877_v60 = vrot.slane %v1876_v11, 1  ;;  %v3337_v51 = vld [vmem:[%s4475_s6 + $0xf8] sm:$0xff]  ;;  %2300 = vmatpush.bf16.msra.mxu0 %v3329_v5 }
 0x3a7   :  { %v1842_v61 = vadd.f32 %v1841_v57, %v1840_v18  ;;  %v1869_v62 = vrot.slane %v1868_v35, 2  ;;  %v1818_v0 = vpop.f32.mrf.mxu0  ;;  %v1831_v1 = vpop.f32.mrf.mxu1  ;;  %v3321_v18 = vld [vmem:[%s4475_s6 + $0x78] sm:$0xff]  ;;  %2313 = vmatpush.bf16.msra.mxu1 %v3337_v51 }
 0x3a8   :  { %v1878_v2 = vadd.f32 %v1877_v60, %v1876_v11  ;;  %v4277_v7 = vmul.f32 0.125, %v1850_v59  ;;  %v1819_v8 = vadd.f32 %v1818_v0, %v1406_v56  ;;  %2287 = vmatpush.bf16.msra.mxu3 %v3321_v18  ;;  %v3320_v0 = vld [vmem:[%s4475_s6 + $0x70] sm:$0xff] }
 0x3a9   :  { %v1843_v9 = vrot.slane %v1842_v61, 1  ;;  %v1870_v10 = vadd.f32 %v1869_v62, %v1868_v35  ;;  %v3312_v62 = vld [vmem:[%s4475_s6 + $0x30] sm:$0xff] }
 0x3aa   :  { %v1896_v15 = vmul.f32 0.125, %v1878_v2  ;;  %v1900_v16 = vmul.f32 %v4277_v7, %v4277_v7  ;;  %v4281_v17 = vadd.f32 %v1831_v1, %v1819_v8  ;;  %v3328_v8 = vld [vmem:[%s4475_s6 + $0xb0] sm:$0xff]  ;;  %2275 = vmatpush.bf16.msra.mxu2 %v3312_v62  ;;  %v3314_v62 = vld [vmem:[%s4475_s6 + $0x40] sm:$0xff] }
 0x3ab   :  { %v1844_v19 = vadd.f32 %v1843_v9, %v1842_v61  ;;  %v1871_v58 = vrot.slane %v1870_v10, 1  ;;  %v3336_v9 = vld [vmem:[%s4475_s6 + $0xf0] sm:$0xff]  ;;  %2301 = vmatpush.bf16.msra.mxu0 %v3328_v8 }
 0x3ac   :  { %v1857_v20 = vrot.slane %v4281_v17, 4  ;;  %v1866_v21 = vmul.f32 %v4281_v17, %v4281_v17  ;;  %v1792_v22 = vpop.f32.mrf.mxu2  ;;  %v1805_v23 = vpop.f32.mrf.mxu3  ;;  %v1904_v24 = vsub.f32 %v1896_v15, %v1900_v16  ;;  %2288 = vmatpush.bf16.msra.mxu3 %v3320_v0  ;;  %2314 = vmatpush.bf16.msra.mxu1 %v3336_v9  ;;  %v3322_v0 = vld [vmem:[%s4475_s6 + $0x80] sm:$0xff] }
 0x3ad   :  { %v1872_v40 = vadd.f32 %v1871_v58, %v1870_v10  ;;  %v4286_v25 = vmul.f32 0.125, %v1844_v19  ;;  %v1793_v27 = vadd.f32 %v1792_v22, %v1405_v14  ;;  %v3311_v19 = vld [vmem:[%s4475_s6 + $0x28] sm:$0xff] }
 0x3ae   :  { %v1858_v3 = vadd.f32 %v1857_v20, %v4281_v17  ;;  %v1885_v45 = vrot.slane %v1866_v21, 4  ;;  %v1908_v32 = vmax.f32 %v1904_v24, 0.0  ;;  %v3319_v58 = vld [vmem:[%s4475_s6 + $0x68] sm:$0xff]  ;;  %2276 = vmatpush.bf16.msra.mxu2 %v3311_v19 }
 0x3af   :  { %v1895_v28 = vmul.f32 0.125, %v1872_v40  ;;  %v1899_v29 = vmul.f32 %v4286_v25, %v4286_v25  ;;  %v4291_v63 = vadd.f32 %v1805_v23, %v1793_v27  ;;  %v1820_v31 = vpop.f32.mrf.mxu0  ;;  %v1833_v34 = vpop.f32.mrf.mxu1  ;;  %v3327_v20 = vld [vmem:[%s4475_s6 + $0xa8] sm:$0xff] }
 0x3b0   :  { %v1859_v33 = vrot.slane %v1858_v3, 2  ;;  %v1886_v13 = vadd.f32 %v1885_v45, %v1866_v21  ;;  %v4297_v4 = vadd.f32 1e-05, %v1908_v32  ;;  %v3335_v24 = vld [vmem:[%s4475_s6 + $0xe8] sm:$0xff]  ;;  %2289 = vmatpush.bf16.msra.mxu3 %v3319_v58  ;;  %2302 = vmatpush.bf16.msra.mxu0 %v3327_v20  ;;  %v3326_v31 = vld [vmem:[%s4475_s6 + $0xa0] sm:$0xff] }
 0x3b1   :  { %v1903_v36 = vsub.f32 %v1895_v28, %v1899_v29  ;;  %v1851_v26 = vrot.slane %v4291_v63, 4  ;;  %v1865_v37 = vmul.f32 %v4291_v63, %v4291_v63  ;;  %2315 = vmatpush.bf16.msra.mxu1 %v3335_v24  ;;  %v3310_v28 = vld [vmem:[%s4475_s6 + $0x20] sm:$0xff] }
 0x3b2   :  { %v1860_v12 = vadd.f32 %v1859_v33, %v1858_v3  ;;  %v1887_v38 = vrot.slane %v1886_v13, 2  ;;  %3366 = vrsqrt.f32 %v4297_v4  ;;  %v3318_v29 = vld [vmem:[%s4475_s6 + $0x60] sm:$0xff]  ;;  %2277 = vmatpush.bf16.msra.mxu2 %v3310_v28  ;;  %vm1931_vm4 = vweird.f32 %v4297_v4 }
 0x3b3   :  { %v1907_v39 = vmax.f32 %v1903_v36, 0.0  ;;  %v1852_v41 = vadd.f32 %v1851_v26, %v4291_v63  ;;  %v1879_v42 = vrot.slane %v1865_v37, 4  ;;  %v3334_v33 = vld [vmem:[%s4475_s6 + $0xe0] sm:$0xff]  ;;  %v3309_v36 = vld [vmem:[%s4475_s6 + $0x18] sm:$0xff] }
 0x3b4   :  { %v1861_v44 = vrot.slane %v1860_v12, 1  ;;  %v1888_v46 = vadd.f32 %v1887_v38, %v1886_v13  ;;  %v1794_v48 = vpop.f32.mrf.mxu2  ;;  %v1807_v30 = vpop.f32.mrf.mxu3  ;;  %2290 = vmatpush.bf16.msra.mxu3 %v3318_v29  ;;  %2303 = vmatpush.bf16.msra.mxu0 %v3326_v31  ;;  %v3317_v26 = vld [vmem:[%s4475_s6 + $0x58] sm:$0xff] }
 0x3b5   :  { %v1853_v49 = vrot.slane %v1852_v41, 2  ;;  %v1880_v53 = vadd.f32 %v1879_v42, %v1865_v37  ;;  %v4308_v55 = vadd.f32 1e-05, %v1907_v39  ;;  %2316 = vmatpush.bf16.msra.mxu1 %v3334_v33  ;;  %v3325_v37 = vld [vmem:[%s4475_s6 + $0x98] sm:$0xff]  ;;  %v3308_v42 = vld [vmem:[%s4475_s6 + $0x10] sm:$0xff] }
 0x3b6   :  { %v1862_v50 = vadd.f32 %v1861_v44, %v1860_v12  ;;  %v1889_v54 = vrot.slane %v1888_v46, 1  ;;  %v3333_v38 = vld [vmem:[%s4475_s6 + $0xd8] sm:$0xff]  ;;  %2278 = vmatpush.bf16.msra.mxu2 %v3309_v36  ;;  %v3316_v44 = vld [vmem:[%s4475_s6 + $0x50] sm:$0xff] }
 0x3b7   :  { %v1854_v11 = vadd.f32 %v1853_v49, %v1852_v41  ;;  %v1881_v43 = vrot.slane %v1880_v53, 2  ;;  %3368 = vrsqrt.f32 %v4308_v55  ;;  %v3324_v48 = vld [vmem:[%s4475_s6 + $0x90] sm:$0xff]  ;;  %vm1921_vm10 = vweird.f32 %v4308_v55 }
 0x3b8   :  { %v1890_v56 = vadd.f32 %v1889_v54, %v1888_v46  ;;  %v4313_v57 = vmul.f32 0.125, %v1862_v50  ;;  %v4342_v21 = vpop.eup %3366  ;;  %2291 = vmatpush.bf16.msra.mxu3 %v3317_v26  ;;  %2304 = vmatpush.bf16.msra.mxu0 %v3325_v37  ;;  %v3332_v30 = vld [vmem:[%s4475_s6 + $0xd0] sm:$0xff]  ;;  %v3307_v54 = vld [vmem:[%s4475_s6 + $0x8] sm:$0xff] }
 0x3b9   :  { %v1855_v35 = vrot.slane %v1854_v11, 1  ;;  %v1882_v59 = vadd.f32 %v1881_v43, %v1880_v53  ;;  %v1926_v45 = vmul.f32 %v4342_v21, %v4297_v4  ;;  %2317 = vmatpush.bf16.msra.mxu1 %v3333_v38  ;;  %v3331_v43 = vld [vmem:[%s4475_s6 + $0xc8] sm:$0xff]  ;;  %vm1932_vm2 = vweird.f32 %v4342_v21 }
 0x3ba   :  { %v1898_v60 = vmul.f32 0.125, %v1890_v56  ;;  %v1902_v61 = vmul.f32 %v4313_v57, %v4313_v57  ;;  %2279 = vmatpush.bf16.msra.mxu2 %v3308_v42  ;;  %vm4435_vm6 = vmor %vm1931_vm4, %vm1932_vm2 }
 0x3bb   :  { %v1856_v1 = vadd.f32 %v1855_v35, %v1854_v11  ;;  %v1883_v2 = vrot.slane %v1882_v59, 1  ;;  %v1927_v12 = vmul.f32 %v4342_v21, %v1926_v45  ;;  %v3323_v11 = vld [vmem:[%s4475_s6 + $0x88] sm:$0xff] }
 0x3bc   :  { %v1906_v10 = vsub.f32 %v1898_v60, %v1902_v61  ;;  %2292 = vmatpush.bf16.msra.mxu3 %v3316_v44  ;;  %2305 = vmatpush.bf16.msra.mxu0 %v3324_v48  ;;  %v3306_v61 = vld [vmem:[%s4475_s6] sm:$0xff] }
 0x3bd   :  { %v1884_v14 = vadd.f32 %v1883_v2, %v1882_v59  ;;  %v4331_v15 = vmul.f32 0.125, %v1856_v1  ;;  %v4351_v27 = vpop.eup %3368  ;;  %v1928_v49 = vmul.f32 0.5, %v1927_v12  ;;  %2318 = vmatpush.bf16.msra.mxu1 %v3332_v30  ;;  %v3330_v1 = vld [vmem:[%s4475_s6 + $0xc0] sm:$0xff]  ;;  %s3536_s6 = smov [#allocation11]  }
 0x3be   :  { %v1910_v16 = vmax.f32 %v1906_v10, 0.0  ;;  %v1916_v13 = vmul.f32 %v4351_v27, %v4308_v55  ;;  %2280 = vmatpush.bf16.msra.mxu2 %v3307_v54  ;;  %vm1922_vm5 = vweird.f32 %v4351_v27  ;;  %s2343_s5 = sshll.u32 %s3536_s6, 4  ;;  %s2344_s5 = int_to_ptr.vmem [resolvable:$true] %s2343_s5 }
 0x3bf   :  { %v1897_v22 = vmul.f32 0.125, %v1884_v14  ;;  %v1901_v23 = vmul.f32 %v4331_v15, %v4331_v15  ;;  %v1929_v51 = vsub.f32 1.5, %v1928_v49  ;;  %vm1923_vm14 = vmor %vm1921_vm10, %vm1922_vm5  ;;  %2348 = dma.vmem_to_hbm [thread:$0]  %s2344_s5, 128, %s2346_s11, [#allocation12]  }
 0x3c0   :  { %v4349_v40 = vadd.f32 1e-05, %v1910_v16  ;;  %v1917_v41 = vmul.f32 %v4351_v27, %v1916_v13  ;;  %2293 = vmatpush.bf16.msra.mxu3 %v3315_v52  ;;  %2306 = vmatpush.bf16.msra.mxu0 %v3323_v11 }
 0x3c1   :  { %v1905_v3 = vsub.f32 %v1897_v22, %v1901_v23  ;;  %2319 = vmatpush.bf16.msra.mxu1 %v3331_v43  ;;  %v1930_v2 = vmul.f32 %v4342_v21, %v1929_v51 }
 0x3c2   :  { %3370 = vrsqrt.f32 %v4349_v40  ;;  %v1918_v50 = vmul.f32 0.5, %v1917_v41  ;;  %vm1951_vm7 = vweird.f32 %v4349_v40  ;;  %2281 = vmatpush.bf16.msra.mxu2 %v3306_v61 }
 0x3c3   :  { %v1909_v34 = vmax.f32 %v1905_v3, 0.0  ;;  %v1934_v4 = vsel %vm4435_vm6, %v4342_v21, %v1930_v2 }
 0x3c4   :  { %v1919_v59 = vsub.f32 1.5, %v1918_v50  ;;  %2294 = vmatpush.bf16.msra.mxu3 %v3314_v62  ;;  %2307 = vmatpush.bf16.msra.mxu0 %v3322_v0  ;;  %v1959_v23 = vrot.slane %v1934_v4, 7 }
 0x3c5   :  { %v4370_v32 = vadd.f32 1e-05, %v1909_v34  ;;  %2320 = vmatpush.bf16.msra.mxu1 %v3330_v1 }
 0x3c6   :  { %v1920_v14 = vmul.f32 %v4351_v27, %v1919_v59 }
 0x3c7   :  { %3372 = vrsqrt.f32 %v4370_v32  ;;  %vm1941_vm15 = vweird.f32 %v4370_v32 }
 0x3c8   :  { %v4386_v39 = vpop.eup %3370  ;;  %v1924_v20 = vsel %vm1923_vm14, %v4351_v27, %v1920_v14 }
 0x3c9   :  { %v1946_v46 = vmul.f32 %v4386_v39, %v4349_v40  ;;  %vm1952_vm3 = vweird.f32 %v4386_v39  ;;  %v1836_v40 = vld [vmem:[#allocation8 + $0x24] ss:$8 sm:$0xf]  ;;  %v1962_v3 = vsel %vm386_vm9, %v1924_v20, %v1959_v23 }
 0x3ca   :  { %vm1953_vm13 = vmor %vm1951_vm7, %vm1952_vm3 }
 0x3cb   :  { %v1947_v53 = vmul.f32 %v4386_v39, %v1946_v46 }
 0x3cd   :  { %v3373_v18 = vpop.eup %3372  ;;  %v1948_v5 = vmul.f32 0.5, %v1947_v53 }
 0x3ce   :  { %v1936_v56 = vmul.f32 %v3373_v18, %v4370_v32  ;;  %vm1942_vm8 = vweird.f32 %v3373_v18 }
 0x3cf   :  { %v1949_v35 = vsub.f32 1.5, %v1948_v5  ;;  %vm1943_vm1 = vmor %vm1941_vm15, %vm1942_vm8 }
 0x3d0   :  { %v1937_v60 = vmul.f32 %v3373_v18, %v1936_v56 }
 0x3d1   :  { %v1950_v8 = vmul.f32 %v4386_v39, %v1949_v35  ;;  %v2081_v35 = vld [vmem:[#allocation8 + $0x26] ss:$0 sm:$0xff] }
 0x3d2   :  { %v1938_v9 = vmul.f32 0.5, %v1937_v60 }
 0x3d3   :  { %v1954_v19 = vsel %vm1953_vm13, %v4386_v39, %v1950_v8  ;;  %v1838_v39 = vld [vmem:[#allocation8 + $0x25] ss:$8 sm:$0xf] }
 0x3d4   :  { %v1939_v16 = vsub.f32 1.5, %v1938_v9  ;;  %v1961_v24 = vrot.slane %v1954_v19, 5 }
 0x3d6   :  { %v1940_v58 = vmul.f32 %v3373_v18, %v1939_v16 }
 0x3d8   :  { %v1944_v22 = vsel %vm1943_vm1, %v3373_v18, %v1940_v58 }
 0x3d9   :  { %v1960_v55 = vrot.slane %v1944_v22, 6 }
 0x3db   :  { %v1963_v45 = vsel %vm388_vm11, %v1960_v55, %v1961_v24 }
 0x3dc   :  { %v1964_v21 = vsel %vm390_vm12, %v1962_v3, %v1963_v45 }
 0x3dd   :  { %v1966_v28 = vmul.f32 %v1964_v21, %v1836_v40 }
 0x3df   :  { %v1970_v29 = vperm.slane %v1966_v28, 2  ;;  %v1971_v31 = vperm.slane %v1966_v28, 3  ;;  %v1969_v34 = vperm.slane %v1966_v28, 1  ;;  %v1968_v33 = vperm.slane %v1966_v28, 0 }
 0x3e1   :  { %v1978_v13 = vmul.f32 %v1970_v29, %v4331_v15  ;;  %v1979_v27 = vmul.f32 %v1971_v31, %v4313_v57  ;;  %v1977_v32 = vmul.f32 %v1969_v34, %v4277_v7  ;;  %v1976_v37 = vmul.f32 %v1968_v33, %v4286_v25 }
 0x3e2   :  { %v1994_v46 = vmul.f32 %v1970_v29, %v4291_v63  ;;  %v1992_v15 = vmul.f32 %v1968_v33, %v4271_v47  ;;  %v1993_v57 = vmul.f32 %v1969_v34, %v4265_v6  ;;  %v1995_v7 = vmul.f32 %v1971_v31, %v4281_v17 }
 0x3e3   :  { %v1985_v36 = vrot.slane %v1978_v13, 6  ;;  %v1986_v26 = vrot.slane %v1979_v27, 5  ;;  %v1984_v12 = vrot.slane %v1977_v32, 7 }
 0x3e5   :  { %v1988_v38 = vsel %vm388_vm11, %v1985_v36, %v1986_v26  ;;  %v1987_v41 = vsel %vm386_vm9, %v1976_v37, %v1984_v12 }
 0x3e6   :  { %v1989_v42 = vsel %vm390_vm12, %v1987_v41, %v1988_v38 }
 0x3e7   :  { %v1991_v44 = vsub.f32 %v1838_v39, %v1989_v42 }
 0x3e9   :  { %v1997_v48 = vperm.slane %v1991_v44, 0  ;;  %v1998_v30 = vperm.slane %v1991_v44, 1  ;;  %v1999_v25 = vperm.slane %v1991_v44, 2  ;;  %v2000_v49 = vperm.slane %v1991_v44, 3 }
 0x3eb   :  { %v2005_v53 = vadd.f32 %v1997_v48, %v1992_v15  ;;  %v2006_v50 = vadd.f32 %v1998_v30, %v1993_v57  ;;  %v2007_v54 = vadd.f32 %v1999_v25, %v1994_v46  ;;  %v2008_v52 = vadd.f32 %v2000_v49, %v1995_v7 }
 0x3ed   :  { %v2009_v18 = vmax.f32 %v2005_v53, 0.0  ;;  %v2010_v5 = vmax.f32 %v2006_v50, 0.0  ;;  %v2011_v11 = vmax.f32 %v2007_v54, 0.0  ;;  %v2012_v43 = vmax.f32 %v2008_v52, 0.0 }
 0x3ef   :  { %v2013_v51 = vpack.c.bf16 %v2009_v18, %v2009_v18  ;;  %v2014_v63 = vpack.c.bf16 %v2010_v5, %v2010_v5  ;;  %v2015_v56 = vpack.c.bf16 %v2011_v11, %v2011_v11  ;;  %v2016_v47 = vpack.c.bf16 %v2012_v43, %v2012_v43 }
 0x3f1   :  { %2282 = vmatmul.bf16.vlgmr.msra.gmra.mxu2 %v2013_v51  ;;  %2295 = vmatmul.bf16.vlgmr.msra.gmra.mxu3 %v2014_v63 }
 0x3f2   :  { %2308 = vmatmul.bf16.vlgmr.msra.gmra.mxu0 %v2015_v56  ;;  %2321 = vmatmul.bf16.vlgmr.msra.gmra.mxu1 %v2016_v47 }
 0x46f   :  { %v2309_v6 = vpop.f32.mrf.mxu0  ;;  %v2322_v17 = vpop.f32.mrf.mxu1 }
 0x474   :  { %v2283_v59 = vpop.f32.mrf.mxu2  ;;  %v2296_v60 = vpop.f32.mrf.mxu3 }
 0x475   :  { %v2284_v61 = vadd.f32 %v2283_v59, %v2081_v35 }
 0x477   :  { %v2297_v62 = vadd.f32 %v2296_v60, %v2284_v61  ;;  %v2311_v0 = vpop.f32.mrf.mxu0  ;;  %v2324_v1 = vpop.f32.mrf.mxu1 }
 0x479   :  { %v2310_v2 = vadd.f32 %v2309_v6, %v2297_v62 }
 0x47b   :  { %v2323_v8 = vadd.f32 %v2322_v17, %v2310_v2 }
 0x47c   :  { %v2285_v9 = vpop.f32.mrf.mxu2  ;;  %v2298_v10 = vpop.f32.mrf.mxu3 }
 0x47d   :  { %2326 = vst.msk [vmem:[#allocation10] sm:$0xff] %vm203_vm0, %v2323_v8 }
 0x47e   :  { %2337 = dma.vmem_to_hbm [thread:$0]  %s2333_s13, 128, %s2335_s15, [#allocation4]  }
 0x47f   :  { %3524 = dma.done.wait [#allocation4], 128  }
 0x480   :  { %3525 = vsyncadd [#allocation4], 4294967168 }
 0x481   :  { %3526 = dma.done.wait [#allocation12], 128  }
 0x482   :  { %3527 = vsyncadd [#allocation12], 4294967168 }
 0x483   :  { %2357 = vsyncpa [#allocation3], 1 }
 0x484   :  { %2358 = vsyncpa [#allocation6], 1 }
 0x485   :  { %2359 = vsyncpa [#allocation9], 1 }
 0x486   :  { %2360 = vsyncpa [#allocation4], 1 }
 0x487   :  { %2361 = vsyncpa [#allocation12], 1 }

</bundles_post_ra>
